<compile_context>
chip_gen: v7x
topology: tpu7x:2x2x1
jax: 0.10.0
libtpu: 0.0.40
codegen_flags: <defaults>
</compile_context>

<pallas_src>
import functools

import jax
import jax.numpy as jnp
import numpy as np
from jax import lax
from jax.experimental import pallas as pl
from jax.experimental.pallas import tpu as pltpu


def _round_up(a, b):
    return -(-a // b) * b


# ----------------------------------------------------------------------------
# Pallas kernel.
#   xp_ref : (1, L, Cin)      bf16, one padded image flattened over (Hp*Wp)+slack
#   w_ref  : (9, Cin, Cout)   bf16, tap-major folded weight (tap = dy*3 + dx)
#   b_ref  : (1, Cout)        f32 folded bias
#   o_ref  : (1, MO, Cout)    MO = H*Wp rows; columns w >= W of each output row
#                             are tap-overrun garbage, sliced off by the wrapper.
# Conv-as-9-shifted-matmuls: out[p] = sum_{dy,dx} x_flat[p + dy*Wp + dx] @ W[dy,dx]
# ----------------------------------------------------------------------------
def _repvgg_kernel(xp_ref, w_ref, b_ref, o_ref, *, wp, mo, compute_dtype):
    # Unpack the streamed tile to f32 once (aligned relayout) so the nine tap
    # slices below are taken from a 32-bit layout: odd sublane offsets on a
    # packed 16-bit layout are the fragile lowering path, f32 offsets are not.
    xf = xp_ref[0].astype(jnp.float32)                      # (L, Cin)
    cout = o_ref.shape[-1]
    acc = jnp.zeros((mo, cout), jnp.float32)
    for dy in range(3):
        for dx in range(3):
            off = dy * wp + dx                              # static tap offset
            lhs = xf[off:off + mo, :].astype(compute_dtype)  # (MO, Cin)
            acc = acc + jnp.dot(lhs, w_ref[dy * 3 + dx],
                                preferred_element_type=jnp.float32)
    # f32 epilogue: bias + ReLU, then cast to the output dtype.
    o_ref[0] = jnp.maximum(acc + b_ref[...], 0.0).astype(o_ref.dtype)


def repvgg_forward_pallas(x, k_equiv, b_equiv, *, compute_dtype=jnp.bfloat16):
    """x: (N, Cin, H, W) NCHW. k_equiv: (Cout, Cin, 3, 3). b_equiv: (Cout,).

    Implements the stride=1, padding=1, groups=1 RepVGGBlock forward
    (conv3x3+BN + conv1x1+BN + identity BN, folded) followed by ReLU.
    """
    N, Cin, H, W = x.shape
    Cout = k_equiv.shape[0]
    Hp, Wp = H + 2, W + 2
    MO = H * Wp                       # flat output rows per image
    L = _round_up(Hp * Wp + 2, 8)     # input rows incl. tap-overrun slack

    # ---- layout glue (1x activation traffic; no 9x slab) --------------------
    xh = jnp.transpose(x, (0, 2, 3, 1))                     # NHWC
    xh = jnp.pad(xh, ((0, 0), (1, 1), (1, 1), (0, 0)))      # spatial zero pad
    xflat = xh.reshape(N, Hp * Wp, Cin)
    xflat = jnp.pad(xflat, ((0, 0), (0, L - Hp * Wp), (0, 0)))
    xflat = xflat.astype(compute_dtype)                     # bf16 stream

    # tap-major weight: w_taps[dy*3+dx, ci, co] = k_equiv[co, ci, dy, dx]
    w_taps = jnp.transpose(k_equiv, (2, 3, 1, 0)).reshape(9, Cin, Cout)
    w_taps = w_taps.astype(compute_dtype)
    bias = b_equiv.reshape(1, Cout).astype(jnp.float32)

    out_dtype = x.dtype

    # ---- VMEM budget (double-buffered tiles + constants + f32 temporaries) --
    itm = jnp.dtype(compute_dtype).itemsize
    otm = jnp.dtype(out_dtype).itemsize
    tile_bytes = (2 * (L * Cin * itm + MO * Cout * otm)       # in/out, 2 bufs
                  + 2 * (9 * Cin * Cout * itm + Cout * 4)     # weight + bias
                  + L * Cin * 4 + MO * Cout * 4)              # f32 unpack + acc
    vmem_limit = None
    if tile_bytes > 24 * 1024 * 1024:
        if tile_bytes > 56 * 1024 * 1024:
            # TODO(synk): row-band tiling with manual halo DMA for huge slabs.
            raise NotImplementedError(
                "per-image activation slab exceeds VMEM; needs row-band tiling")
        # Stay below v7x's 64 MiB physical VMEM; v5e/v6e have ample headroom.
        vmem_limit = min(int(tile_bytes * 1.15) + (1 << 20), 60 * 1024 * 1024)

    flops = 2 * N * H * W * Cout * Cin * 9
    bytes_accessed = (xflat.size * itm + w_taps.size * itm + bias.size * 4
                      + N * MO * Cout * otm)

    kernel = functools.partial(_repvgg_kernel, wp=Wp, mo=MO,
                               compute_dtype=compute_dtype)

    out_flat = pl.pallas_call(
        kernel,
        out_shape=jax.ShapeDtypeStruct((N, MO, Cout), out_dtype),
        grid=(N,),
        in_specs=[
            pl.BlockSpec((1, L, Cin), lambda n: (n, 0, 0)),      # image slab
            pl.BlockSpec((9, Cin, Cout), lambda n: (0, 0, 0)),   # folded weight
            pl.BlockSpec((1, Cout), lambda n: (0, 0)),           # folded bias
        ],
        out_specs=pl.BlockSpec((1, MO, Cout), lambda n: (n, 0, 0)),
        compiler_params=pltpu.CompilerParams(
            dimension_semantics=("parallel",),
            vmem_limit_bytes=vmem_limit),
        cost_estimate=pl.CostEstimate(flops=flops, transcendentals=0,
                                      bytes_accessed=bytes_accessed),
    )(xflat, w_taps, bias)

    # (N, H*Wp, Cout): drop the 2 tap-overrun columns per row, back to NCHW.
    y = out_flat.reshape(N, H, Wp, Cout)[:, :, :W, :]
    return jnp.transpose(y, (0, 3, 1, 2))


# ----------------------------------------------------------------------------
# Parameter construction: Conv(no bias) + BatchNorm2d (eval mode), folded.
# ----------------------------------------------------------------------------
def make_bn(key, c, eps=1e-5):
    kg, kb, km, kv = jax.random.split(key, 4)
    gamma = 1.0 + 0.1 * jax.random.normal(kg, (c,), jnp.float32)
    beta = 0.1 * jax.random.normal(kb, (c,), jnp.float32)
    mean = 0.1 * jax.random.normal(km, (c,), jnp.float32)
    var = jnp.abs(jax.random.normal(kv, (c,), jnp.float32)) + 0.5
    scale = gamma / jnp.sqrt(var + eps)
    bias = beta - mean * scale
    return scale, bias


def make_repvgg_params(key, cin, cout):
    kw3, kbn3, kw1, kbn1, kbnid = jax.random.split(key, 5)
    w3 = jax.random.normal(kw3, (cout, cin, 3, 3), jnp.float32) / np.sqrt(cin * 9)
    w1 = jax.random.normal(kw1, (cout, cin, 1, 1), jnp.float32) / np.sqrt(cin)
    s3, b3 = make_bn(kbn3, cout)
    s1, b1 = make_bn(kbn1, cout)
    w3_eff = w3 * s3[:, None, None, None]
    w1_eff = w1 * s1[:, None, None, None]

    id_sb = None
    if cin == cout:                                  # rbr_identity branch active
        id_sb = make_bn(kbnid, cin)

    # RepVGG reparameterization: equivalent single 3x3 kernel + bias.
    k_equiv = w3_eff + jnp.pad(w1_eff, ((0, 0), (0, 0), (1, 1), (1, 1)))
    b_equiv = b3 + b1
    if id_sb is not None:
        sid, bid = id_sb
        id_k = jnp.zeros((cout, cin, 3, 3), jnp.float32)
        id_k = id_k.at[jnp.arange(cout), jnp.arange(cin), 1, 1].set(sid)
        k_equiv = k_equiv + id_k
        b_equiv = b_equiv + bid

    branch_params = ((w3_eff, b3), (w1_eff, b1), id_sb)
    return k_equiv, b_equiv, branch_params


# ----------------------------------------------------------------------------
# Pure-JAX reference mirroring the PyTorch forward (three explicit branches).
# ----------------------------------------------------------------------------
def repvgg_reference(x, branch_params):
    (w3, b3), (w1, b1), id_sb = branch_params
    dn = ("NCHW", "OIHW", "NCHW")
    y = lax.conv_general_dilated(x, w3, (1, 1), ((1, 1), (1, 1)),
                                 dimension_numbers=dn,
                                 precision=lax.Precision.HIGHEST)
    y = y + b3[None, :, None, None]
    y1 = lax.conv_general_dilated(x, w1, (1, 1), ((0, 0), (0, 0)),
                                  dimension_numbers=dn,
                                  precision=lax.Precision.HIGHEST)
    y = y + y1 + b1[None, :, None, None]
    if id_sb is not None:
        sid, bid = id_sb
        y = y + x * sid[None, :, None, None] + bid[None, :, None, None]
    return jnp.maximum(y, 0.0)


if __name__ == "__main__":
    # RepVGGBlock(in_channels=8, out_channels=8, k=3, stride=1, padding=1)
    # -> identity branch active (in == out, stride == 1).
    in_channels, out_channels = 8, 8
    N, H, W = 2, 16, 16

    key = jax.random.PRNGKey(0)
    kx, kp = jax.random.split(key, 2)
    x = jax.random.normal(kx, (N, in_channels, H, W), jnp.float32)

    k_equiv, b_equiv, branch_params = make_repvgg_params(kp, in_channels, out_channels)

    out = jax.block_until_ready(repvgg_forward_pallas(x, k_equiv, b_equiv))
    ref = jax.block_until_ready(repvgg_reference(x, branch_params))

    assert out.shape == (N, out_channels, H, W), out.shape
    # bf16-streamed operands with f32 accumulation -> bf16-level tolerance.
    np.testing.assert_allclose(np.asarray(out), np.asarray(ref),
                               rtol=6e-2, atol=6e-2)
    print("KERNEL_OK")
</pallas_src>

<mosaic_0001>
module attributes {stable_mosaic.version = 11 : i64} {
  func.func @_repvgg_kernel(%arg0: i32, %arg1: memref<1x328x8xbf16, #tpu.memory_space<vmem>>, %arg2: memref<9x8x8xbf16, #tpu.memory_space<vmem>>, %arg3: memref<1x8xf32, #tpu.memory_space<vmem>>, %arg4: memref<1x288x8xf32, #tpu.memory_space<vmem>>) attributes {dimension_semantics = [#tpu.dimension_semantics<parallel>], iteration_bounds = array<i64: 2>, scalar_prefetch = 0 : i64, scratch_operands = 0 : i64, tpu.core_type = #tpu.core_type<tc>, window_params = [{transform_indices = @transform_0, window_bounds = array<i64: 1, 328, 8>}, {pipeline_mode = #tpu.pipeline_mode<synchronous>, transform_indices = @transform_1, window_bounds = array<i64: 9, 8, 8>}, {pipeline_mode = #tpu.pipeline_mode<synchronous>, transform_indices = @transform_2, window_bounds = array<i64: 1, 8>}, {transform_indices = @transform_3, window_bounds = array<i64: 1, 288, 8>}]} {
    %c0 = arith.constant 0 : index
    %c0_0 = arith.constant 0 : index
    %c0_1 = arith.constant 0 : index
    %0 = vector.load %arg1[%c0, %c0_0, %c0_1] : memref<1x328x8xbf16, #tpu.memory_space<vmem>>, vector<1x328x8xbf16>
    %1 = vector.shape_cast %0 : vector<1x328x8xbf16> to vector<328x8xbf16>
    %2 = arith.extf %1 : vector<328x8xbf16> to vector<328x8xf32>
    %cst = arith.constant 0.000000e+00 : f32
    %3 = vector.broadcast %cst : f32 to vector<288x8xf32>
    %4 = vector.extract_strided_slice %2 {offsets = [0, 0], sizes = [288, 8], strides = [1, 1]} : vector<328x8xf32> to vector<288x8xf32>
    %5 = arith.truncf %4 : vector<288x8xf32> to vector<288x8xbf16>
    %c0_2 = arith.constant 0 : index
    %c0_3 = arith.constant 0 : index
    %c0_4 = arith.constant 0 : index
    %6 = vector.load %arg2[%c0_2, %c0_3, %c0_4] : memref<9x8x8xbf16, #tpu.memory_space<vmem>>, vector<1x8x8xbf16>
    %7 = vector.shape_cast %6 : vector<1x8x8xbf16> to vector<8x8xbf16>
    %cst_5 = arith.constant dense<0.000000e+00> : vector<288x8xf32>
    %8 = tpu.matmul %5, %7, %cst_5 {dimension_numbers = #tpu.dot_dimension_numbers<[1], [0], [0], [1], [0, 0, 1, 1], [], []>} : vector<288x8xbf16>, vector<8x8xbf16>, vector<288x8xf32> -> vector<288x8xf32>
    %9 = arith.addf %3, %8 : vector<288x8xf32>
    %10 = vector.extract_strided_slice %2 {offsets = [1, 0], sizes = [288, 8], strides = [1, 1]} : vector<328x8xf32> to vector<288x8xf32>
    %11 = arith.truncf %10 : vector<288x8xf32> to vector<288x8xbf16>
    %c1 = arith.constant 1 : index
    %c0_6 = arith.constant 0 : index
    %c0_7 = arith.constant 0 : index
    %12 = vector.load %arg2[%c1, %c0_6, %c0_7] : memref<9x8x8xbf16, #tpu.memory_space<vmem>>, vector<1x8x8xbf16>
    %13 = vector.shape_cast %12 : vector<1x8x8xbf16> to vector<8x8xbf16>
    %cst_8 = arith.constant dense<0.000000e+00> : vector<288x8xf32>
    %14 = tpu.matmul %11, %13, %cst_8 {dimension_numbers = #tpu.dot_dimension_numbers<[1], [0], [0], [1], [0, 0, 1, 1], [], []>} : vector<288x8xbf16>, vector<8x8xbf16>, vector<288x8xf32> -> vector<288x8xf32>
    %15 = arith.addf %9, %14 : vector<288x8xf32>
    %16 = vector.extract_strided_slice %2 {offsets = [2, 0], sizes = [288, 8], strides = [1, 1]} : vector<328x8xf32> to vector<288x8xf32>
    %17 = arith.truncf %16 : vector<288x8xf32> to vector<288x8xbf16>
    %c2 = arith.constant 2 : index
    %c0_9 = arith.constant 0 : index
    %c0_10 = arith.constant 0 : index
    %18 = vector.load %arg2[%c2, %c0_9, %c0_10] : memref<9x8x8xbf16, #tpu.memory_space<vmem>>, vector<1x8x8xbf16>
    %19 = vector.shape_cast %18 : vector<1x8x8xbf16> to vector<8x8xbf16>
    %cst_11 = arith.constant dense<0.000000e+00> : vector<288x8xf32>
    %20 = tpu.matmul %17, %19, %cst_11 {dimension_numbers = #tpu.dot_dimension_numbers<[1], [0], [0], [1], [0, 0, 1, 1], [], []>} : vector<288x8xbf16>, vector<8x8xbf16>, vector<288x8xf32> -> vector<288x8xf32>
    %21 = arith.addf %15, %20 : vector<288x8xf32>
    %22 = vector.extract_strided_slice %2 {offsets = [18, 0], sizes = [288, 8], strides = [1, 1]} : vector<328x8xf32> to vector<288x8xf32>
    %23 = arith.truncf %22 : vector<288x8xf32> to vector<288x8xbf16>
    %c3 = arith.constant 3 : index
    %c0_12 = arith.constant 0 : index
    %c0_13 = arith.constant 0 : index
    %24 = vector.load %arg2[%c3, %c0_12, %c0_13] : memref<9x8x8xbf16, #tpu.memory_space<vmem>>, vector<1x8x8xbf16>
    %25 = vector.shape_cast %24 : vector<1x8x8xbf16> to vector<8x8xbf16>
    %cst_14 = arith.constant dense<0.000000e+00> : vector<288x8xf32>
    %26 = tpu.matmul %23, %25, %cst_14 {dimension_numbers = #tpu.dot_dimension_numbers<[1], [0], [0], [1], [0, 0, 1, 1], [], []>} : vector<288x8xbf16>, vector<8x8xbf16>, vector<288x8xf32> -> vector<288x8xf32>
    %27 = arith.addf %21, %26 : vector<288x8xf32>
    %28 = vector.extract_strided_slice %2 {offsets = [19, 0], sizes = [288, 8], strides = [1, 1]} : vector<328x8xf32> to vector<288x8xf32>
    %29 = arith.truncf %28 : vector<288x8xf32> to vector<288x8xbf16>
    %c4 = arith.constant 4 : index
    %c0_15 = arith.constant 0 : index
    %c0_16 = arith.constant 0 : index
    %30 = vector.load %arg2[%c4, %c0_15, %c0_16] : memref<9x8x8xbf16, #tpu.memory_space<vmem>>, vector<1x8x8xbf16>
    %31 = vector.shape_cast %30 : vector<1x8x8xbf16> to vector<8x8xbf16>
    %cst_17 = arith.constant dense<0.000000e+00> : vector<288x8xf32>
    %32 = tpu.matmul %29, %31, %cst_17 {dimension_numbers = #tpu.dot_dimension_numbers<[1], [0], [0], [1], [0, 0, 1, 1], [], []>} : vector<288x8xbf16>, vector<8x8xbf16>, vector<288x8xf32> -> vector<288x8xf32>
    %33 = arith.addf %27, %32 : vector<288x8xf32>
    %34 = vector.extract_strided_slice %2 {offsets = [20, 0], sizes = [288, 8], strides = [1, 1]} : vector<328x8xf32> to vector<288x8xf32>
    %35 = arith.truncf %34 : vector<288x8xf32> to vector<288x8xbf16>
    %c5 = arith.constant 5 : index
    %c0_18 = arith.constant 0 : index
    %c0_19 = arith.constant 0 : index
    %36 = vector.load %arg2[%c5, %c0_18, %c0_19] : memref<9x8x8xbf16, #tpu.memory_space<vmem>>, vector<1x8x8xbf16>
    %37 = vector.shape_cast %36 : vector<1x8x8xbf16> to vector<8x8xbf16>
    %cst_20 = arith.constant dense<0.000000e+00> : vector<288x8xf32>
    %38 = tpu.matmul %35, %37, %cst_20 {dimension_numbers = #tpu.dot_dimension_numbers<[1], [0], [0], [1], [0, 0, 1, 1], [], []>} : vector<288x8xbf16>, vector<8x8xbf16>, vector<288x8xf32> -> vector<288x8xf32>
    %39 = arith.addf %33, %38 : vector<288x8xf32>
    %40 = vector.extract_strided_slice %2 {offsets = [36, 0], sizes = [288, 8], strides = [1, 1]} : vector<328x8xf32> to vector<288x8xf32>
    %41 = arith.truncf %40 : vector<288x8xf32> to vector<288x8xbf16>
    %c6 = arith.constant 6 : index
    %c0_21 = arith.constant 0 : index
    %c0_22 = arith.constant 0 : index
    %42 = vector.load %arg2[%c6, %c0_21, %c0_22] : memref<9x8x8xbf16, #tpu.memory_space<vmem>>, vector<1x8x8xbf16>
    %43 = vector.shape_cast %42 : vector<1x8x8xbf16> to vector<8x8xbf16>
    %cst_23 = arith.constant dense<0.000000e+00> : vector<288x8xf32>
    %44 = tpu.matmul %41, %43, %cst_23 {dimension_numbers = #tpu.dot_dimension_numbers<[1], [0], [0], [1], [0, 0, 1, 1], [], []>} : vector<288x8xbf16>, vector<8x8xbf16>, vector<288x8xf32> -> vector<288x8xf32>
    %45 = arith.addf %39, %44 : vector<288x8xf32>
    %46 = vector.extract_strided_slice %2 {offsets = [37, 0], sizes = [288, 8], strides = [1, 1]} : vector<328x8xf32> to vector<288x8xf32>
    %47 = arith.truncf %46 : vector<288x8xf32> to vector<288x8xbf16>
    %c7 = arith.constant 7 : index
    %c0_24 = arith.constant 0 : index
    %c0_25 = arith.constant 0 : index
    %48 = vector.load %arg2[%c7, %c0_24, %c0_25] : memref<9x8x8xbf16, #tpu.memory_space<vmem>>, vector<1x8x8xbf16>
    %49 = vector.shape_cast %48 : vector<1x8x8xbf16> to vector<8x8xbf16>
    %cst_26 = arith.constant dense<0.000000e+00> : vector<288x8xf32>
    %50 = tpu.matmul %47, %49, %cst_26 {dimension_numbers = #tpu.dot_dimension_numbers<[1], [0], [0], [1], [0, 0, 1, 1], [], []>} : vector<288x8xbf16>, vector<8x8xbf16>, vector<288x8xf32> -> vector<288x8xf32>
    %51 = arith.addf %45, %50 : vector<288x8xf32>
    %52 = vector.extract_strided_slice %2 {offsets = [38, 0], sizes = [288, 8], strides = [1, 1]} : vector<328x8xf32> to vector<288x8xf32>
    %53 = arith.truncf %52 : vector<288x8xf32> to vector<288x8xbf16>
    %c8 = arith.constant 8 : index
    %c0_27 = arith.constant 0 : index
    %c0_28 = arith.constant 0 : index
    %54 = vector.load %arg2[%c8, %c0_27, %c0_28] : memref<9x8x8xbf16, #tpu.memory_space<vmem>>, vector<1x8x8xbf16>
    %55 = vector.shape_cast %54 : vector<1x8x8xbf16> to vector<8x8xbf16>
    %cst_29 = arith.constant dense<0.000000e+00> : vector<288x8xf32>
    %56 = tpu.matmul %53, %55, %cst_29 {dimension_numbers = #tpu.dot_dimension_numbers<[1], [0], [0], [1], [0, 0, 1, 1], [], []>} : vector<288x8xbf16>, vector<8x8xbf16>, vector<288x8xf32> -> vector<288x8xf32>
    %57 = arith.addf %51, %56 : vector<288x8xf32>
    %c0_30 = arith.constant 0 : index
    %c0_31 = arith.constant 0 : index
    %58 = vector.load %arg3[%c0_30, %c0_31] : memref<1x8xf32, #tpu.memory_space<vmem>>, vector<1x8xf32>
    %59 = vector.broadcast %58 : vector<1x8xf32> to vector<288x8xf32>
    %60 = arith.addf %57, %59 : vector<288x8xf32>
    %cst_32 = arith.constant 0.000000e+00 : f32
    %61 = vector.broadcast %cst_32 : f32 to vector<288x8xf32>
    %62 = arith.maximumf %60, %61 : vector<288x8xf32>
    %c0_33 = arith.constant 0 : index
    %c0_34 = arith.constant 0 : index
    %c0_35 = arith.constant 0 : index
    %63 = vector.load %arg4[%c0_33, %c0_34, %c0_35] : memref<1x288x8xf32, #tpu.memory_space<vmem>>, vector<1x288x8xf32>
    %64 = vector.shape_cast %63 : vector<1x288x8xf32> to vector<288x8xf32>
    %65 = vector.shape_cast %62 : vector<288x8xf32> to vector<1x288x8xf32>
    tpu.vector_store %arg4[%c0_33, %c0_34, %c0_35], %65 {strides = array<i32>} : memref<1x288x8xf32, #tpu.memory_space<vmem>>, vector<1x288x8xf32>,
    return
  }
  func.func @transform_0(%arg0: i32) -> (i32, i32, i32) {
    %c0_i32 = arith.constant 0 : i32
    %c0_i32_0 = arith.constant 0 : i32
    %c0_i32_1 = arith.constant 0 : i32
    return %arg0, %c0_i32, %c0_i32_0 : i32, i32, i32
  }
  func.func @transform_1(%arg0: i32) -> (i32, i32, i32) {
    %c0_i32 = arith.constant 0 : i32
    %c0_i32_0 = arith.constant 0 : i32
    %c0_i32_1 = arith.constant 0 : i32
    %c0_i32_2 = arith.constant 0 : i32
    return %c0_i32, %c0_i32_0, %c0_i32_1 : i32, i32, i32
  }
  func.func @transform_2(%arg0: i32) -> (i32, i32) {
    %c0_i32 = arith.constant 0 : i32
    %c0_i32_0 = arith.constant 0 : i32
    %c0_i32_1 = arith.constant 0 : i32
    return %c0_i32, %c0_i32_0 : i32, i32
  }
  func.func @transform_3(%arg0: i32) -> (i32, i32, i32) {
    %c0_i32 = arith.constant 0 : i32
    %c0_i32_0 = arith.constant 0 : i32
    %c0_i32_1 = arith.constant 0 : i32
    return %arg0, %c0_i32, %c0_i32_0 : i32, i32, i32
  }
}

</mosaic_0001>

<bundles_post_ra>
// kernel: tpu_custom_call.1
= control target key start
LH: loop header
LB: loop body
LE: loop exit
PB: predicated region body
PF: predicated region fallthrough
CT: control target
= control target key end

     0   :  { %s4253_s12 = smov 0   ;;  %s5314_s0 = inlined_call_operand.vmem [shape: bf16[2,328,8], index: 0, kind: input, shape index: {}]   ;;  %s5315_s1 = inlined_call_operand.vmem [shape: bf16[9,8,8], index: 1, kind: input, shape index: {}]   ;;  %s5316_s2 = inlined_call_operand.vmem [shape: f32[1,8], index: 2, kind: input, shape index: {}]   ;;  %s5317_s3 = inlined_call_operand.vmem [shape: f32[2,288,8], index: 3, kind: output, shape index: {}]  }
   0x1 LB: > { %s3176_s13 = sadd.s32 4294967295, %s4231_s12   ;;  %p3180_p0 = scmp.ge.s32.totalorder %s4231_s12, 1  ;;  %s4231_s12 = sphi %s4253_s12, %s13_s12  }
   0x2   : > { %p137_p1 = scmp.lt.s32.totalorder %s4231_s12, 3 }
   0x4   : > { %p138_p2 = pnand %p3180_p0, %p137_p1 }
   0x6   : > { %141 = sbr.rel (%p138_p2) target bundleno = 572 (0x23c), region = 32 }
   0xd   : > { %vm480_vm0 = vcmask 1043456   ;;  %v4264_v0 = vld [vmem:[%s5315_s1 + $0x10] sm:$0xf]  ;;  %v3202_v1 = vld [vmem:[%s5315_s1 + $0x4] sm:$0xf]  ;;  %p161_p3 = scmp.lt.s32.totalorder %s3176_s13, 1 }
   0xe   : > { %4186 = vmatprep.subr.msk.bf16.mxu0 %vm480_vm0, %v4264_v0  ;;  %4182 = vmatprep.subr.msk.bf16.mxu1 %vm480_vm0, %v3202_v1  ;;  %v4274_v2 = vsel %vm480_vm0, %v4264_v0, 0  ;;  %v482_v3 = vsel %vm480_vm0, %v3202_v1, 0  ;;  %v3298_v4 = vld [vmem:[%s5315_s1 + $0x14] sm:$0xf]  ;;  %v272_v5 = vld [vmem:[%s5315_s1] sm:$0xf] }
   0xf   : > { %5349 = vst [vmem:[#allocation2_spill] sm:$0xff] %v4274_v2  ;;  %3703 = vmatpush3.bf16.msra.mxu0 %v4274_v2  ;;  %3551 = vmatpush3.bf16.msra.mxu1 %v482_v3  ;;  %s5386_s13 = smov (!%p161_p3, %s3176_s13), 1  ;;  %vm276_vm1 = vsmask.f32 7424  ;;  %vm1440_vm2 = vsmask.f32 6400 }
  0x10   : > { %4188 = vmatprep.subr.msk.bf16.mxu0 %vm480_vm0, %v3298_v4  ;;  %s4192_s22 = smul.u32 164, %s5386_s13  ;;  %4183 = vmatprep.subr.msk.bf16.mxu1 %vm480_vm0, %v272_v5  ;;  %vm425_vm3 = vcmask 64512   ;;  %v1891_v8 = vsel %vm480_vm0, %v3298_v4, 0  ;;  %v698_v10 = vsel %vm480_vm0, %v272_v5, 0  ;;  %v4339_v36 = vld [vmem:[%s5315_s1 + $0x8] sm:$0xf] }
  0x11   : > { %v4370_v51 = vld [vmem:[%s5315_s1 + $0x18] sm:$0xf]  ;;  %vm1798_vm4 = vcmask 1045504   ;;  %vm2340_vm5 = vsmask.f32 5376  ;;  %vm898_vm6 = vcmask 1046528  }
  0x12   : > { %s4292_s25 = scalar_lea.vmem %s5314_s0, %s4192_s22  ;;  %vm2698_vm7 = vcmask 1044480   ;;  %s4193_s9 = smul.u32 288, %s5386_s13 }
  0x13   : > { %v4295_v6 = vld [vmem:[%s4292_s25] sm:$0xff]   ;;  %v4298_v7 = vld [vmem:[%s4292_s25 + $0x8] sm:$0xff]   ;;  %v4302_v9 = vld [vmem:[%s4292_s25 + $0x10] sm:$0xff]  }
  0x14   : > { %v278_v11 = vshrl.u32 %v4295_v6, 16  ;;  %v280_v12 = vshll.u32 %v4295_v6, 16  ;;  %v285_v13 = vshll.u32 %v4298_v7, 16  ;;  %v289_v14 = vshrl.u32 %v4298_v7, 16  ;;  %v4316_v17 = vld [vmem:[%s4292_s25 + $0x18] sm:$0xff]   ;;  %v4319_v18 = vld [vmem:[%s4292_s25 + $0x20] sm:$0xff]   ;;  %s5194_s16 = scalar_lea.vmem %s5317_s3, %s4193_s9 }
  0x15   : > { %v4310_v15 = vshll.u32 %v4302_v9, 16  ;;  %v4313_v16 = vshrl.u32 %v4302_v9, 16  ;;  %v4325_v26 = vshll.u32 %v4316_v17, 16  ;;  %v4328_v30 = vshrl.u32 %v4316_v17, 16  ;;  %v4331_v31 = vld [vmem:[%s4292_s25 + $0x28] sm:$0xff]   ;;  %v4348_v41 = vld [vmem:[%s4292_s25 + $0x30] sm:$0xff]  }
  0x16   : > { %v282_v19 = vrot.slane %v280_v12, 1  ;;  %v287_v20 = vrot.slane %v285_v13, 1  ;;  %v1441_v21 = vrot.slane %v289_v14, 1  ;;  %v1442_v22 = vrot.slane %v285_v13, 2  ;;  %v4365_v50 = vld [vmem:[%s4292_s25 + $0x38] sm:$0xff]   ;;  %v4393_v63 = vld [vmem:[%s4292_s25 + $0x40] sm:$0xff]  }
  0x17   : > { %v1444_v23 = vrot.slane %v4313_v16, 1  ;;  %v1445_v24 = vrot.slane %v4310_v15, 2  ;;  %v295_v25 = vrot.slane %v4310_v15, 1  ;;  %v1449_v33 = vrot.slane %v4325_v26, 2 }
  0x18   : > { %v283_v27 = vor.u32 %v282_v19, %v278_v11  ;;  %v291_v28 = vor.u32 %v289_v14, %v287_v20  ;;  %v1443_v29 = vor.u32 %v1442_v22, %v1441_v21  ;;  %v303_v35 = vrot.slane %v4325_v26, 1 }
  0x19   : > { %v1446_v32 = vor.u32 %v1445_v24, %v1444_v23  ;;  %v299_v34 = vor.u32 %v4313_v16, %v295_v25  ;;  %v1448_v39 = vrot.slane %v4328_v30, 1  ;;  %v4345_v40 = vshll.u32 %v4319_v18, 16  ;;  %v4420_v23 = vld [vmem:[%s4292_s25 + $0x48] sm:$0xff]  }
  0x1a   : > { %v288_v37 = vsel %vm276_vm1, %v283_v27, %v287_v20  ;;  %v296_v38 = vsel %vm276_vm1, %v291_v28, %v295_v25  ;;  %v4354_v44 = vshrl.u32 %v4319_v18, 16  ;;  %v307_v45 = vor.u32 %v4328_v30, %v303_v35  ;;  %v4427_v28 = vld [vmem:[%s4292_s25 + $0x50] sm:$0xff]  }
  0x1b   : > { %3552 = vmatprep.mubr.msk.bf16.mxu1 %vm425_vm3, %v288_v37  ;;  %v1447_v42 = vsel %vm1440_vm2, %v1443_v29, %v1446_v32  ;;  %v304_v43 = vsel %vm276_vm1, %v299_v34, %v303_v35  ;;  %v1450_v46 = vor.u32 %v1449_v33, %v1448_v39  ;;  %v1453_v47 = vrot.slane %v4345_v40, 2 }
  0x1c   : > { %3704 = vmatprep.mubr.msk.bf16.mxu0 %vm425_vm3, %v1447_v42  ;;  %3553 = vmatmul.mubr.msk.bf16.vlgmr.msra.gmra.mrb[0].mxu1 %vm425_vm3, %v296_v38  ;;  %v311_v48 = vrot.slane %v4345_v40, 1  ;;  %v4362_v49 = vshll.u32 %v4331_v31, 16  ;;  %v1452_v52 = vrot.slane %v4354_v44, 1  ;;  %v4375_v53 = vshrl.u32 %v4331_v31, 16 }
  0x1d   : > { %3556 = vmatprep.mubr.msk.bf16.mxu1 %vm425_vm3, %v304_v43  ;;  %3589 = vmatpush3.bf16.msra.mxu1 %v698_v10  ;;  %v4378_v54 = vshll.u32 %v4348_v41, 16  ;;  %v4381_v55 = vshrl.u32 %v4348_v41, 16  ;;  %v1451_v56 = vsel %vm1440_vm2, %v1446_v32, %v1450_v46  ;;  %v4397_v3 = vshll.u32 %v4365_v50, 16 }
  0x1e   : > { %v1457_v57 = vrot.slane %v4362_v49, 2  ;;  %v315_v58 = vor.u32 %v4354_v44, %v311_v48  ;;  %4184 = vmatprep.subr.msk.bf16.mxu1 %vm480_vm0, %v4339_v36  ;;  %3705 = vmatmul.mubr.msk.bf16.vlgmr.msra.gmra.mrb[0].mxu0 %vm425_vm3, %v1451_v56  ;;  %v1454_v59 = vor.u32 %v1453_v47, %v1452_v52  ;;  %v1456_v60 = vrot.slane %v4375_v53, 1  ;;  %v4454_v56 = vld [vmem:[%s4292_s25 + $0x58] sm:$0xff]  }
  0x1f   : > { %v319_v61 = vrot.slane %v4362_v49, 1  ;;  %v1460_v62 = vrot.slane %v4381_v55, 1  ;;  %3741 = vmatpush3.bf16.msra.mxu0 %v1891_v8  ;;  %v1461_v1 = vrot.slane %v4378_v54, 2  ;;  %v4400_v4 = vshrl.u32 %v4365_v50, 16 }
  0x20   : > { %v1455_v5 = vsel %vm1440_vm2, %v1450_v46, %v1454_v59  ;;  %v312_v10 = vsel %vm276_vm1, %v307_v45, %v311_v48  ;;  %v1458_v11 = vor.u32 %v1457_v57, %v1456_v60  ;;  %4189 = vmatprep.subr.msk.bf16.mxu0 %vm480_vm0, %v4370_v51  ;;  %v327_v13 = vrot.slane %v4378_v54, 1 }
  0x21   : > { %3708 = vmatprep.mubr.msk.bf16.mxu0 %vm425_vm3, %v1455_v5  ;;  %v320_v8 = vsel %vm276_vm1, %v315_v58, %v319_v61  ;;  %v1462_v12 = vor.u32 %v1461_v1, %v1460_v62  ;;  %v4410_v14 = vshll.u32 %v4393_v63, 16  ;;  %v1464_v20 = vrot.slane %v4400_v4, 1 }
  0x22   : > { %v1459_v19 = vsel %vm1440_vm2, %v1454_v59, %v1458_v11  ;;  %v1465_v21 = vrot.slane %v4397_v3, 2  ;;  %v4417_v22 = vshrl.u32 %v4393_v63, 16  ;;  %v323_v25 = vor.u32 %v4375_v53, %v319_v61 }
  0x23   : > { %v1463_v24 = vsel %vm1440_vm2, %v1458_v11, %v1462_v12  ;;  %v1469_v27 = vrot.slane %v4410_v14, 2  ;;  %v331_v29 = vor.u32 %v4381_v55, %v327_v13  ;;  %v335_v32 = vrot.slane %v4397_v3, 1 }
  0x24   : > { %3557 = vmatmul.mubr.msk.bf16.gmra.mrb[4].mxu1 %vm425_vm3, %v312_v10  ;;  %v1468_v33 = vrot.slane %v4417_v22, 1  ;;  %v1466_v34 = vor.u32 %v1465_v21, %v1464_v20  ;;  %v4435_v35 = vshll.u32 %v4420_v23, 16  ;;  %v4438_v37 = vshrl.u32 %v4420_v23, 16 }
  0x25   : > { %3560 = vmatprep.mubr.msk.bf16.mxu1 %vm425_vm3, %v320_v8  ;;  %v328_v38 = vsel %vm276_vm1, %v323_v25, %v327_v13  ;;  %v4442_v42 = vshll.u32 %v4427_v28, 16  ;;  %v4445_v43 = vshrl.u32 %v4427_v28, 16  ;;  %v336_v45 = vsel %vm276_vm1, %v331_v29, %v335_v32  ;;  %v4474_v13 = vld [vmem:[%s4292_s25 + $0x88] sm:$0xff]   ;;  %v4482_v25 = vld [vmem:[%s4292_s25 + $0x60] sm:$0xff]  }
  0x26   : > { %3709 = vmatmul.mubr.msk.bf16.gmra.mrb[4].mxu0 %vm425_vm3, %v1459_v19  ;;  %v1470_v39 = vor.u32 %v1469_v27, %v1468_v33  ;;  %v1467_v46 = vsel %vm1440_vm2, %v1462_v12, %v1466_v34  ;;  %v343_v47 = vrot.slane %v4410_v14, 1  ;;  %v1472_v48 = vrot.slane %v4438_v37, 1  ;;  %v208_v27 = vld [vmem:[%s4292_s25 + $0x90] sm:$0xf] }
  0x27   : > { %3712 = vmatprep.mubr.msk.bf16.mxu0 %vm425_vm3, %v1463_v24  ;;  %v1473_v52 = vrot.slane %v4435_v35, 2  ;;  %v339_v58 = vor.u32 %v4400_v4, %v335_v32  ;;  %v1476_v59 = vrot.slane %v4445_v43, 1  ;;  %v1477_v60 = vrot.slane %v4442_v42, 2 }
  0x28   : > { %v1471_v57 = vsel %vm1440_vm2, %v1466_v34, %v1470_v39  ;;  %v347_v61 = vor.u32 %v4417_v22, %v343_v47  ;;  %v351_v62 = vrot.slane %v4435_v35, 1  ;;  %v4466_v5 = vshll.u32 %v4454_v56, 16 }
  0x29   : > { %v1474_v1 = vor.u32 %v1473_v52, %v1472_v48  ;;  %v4469_v10 = vshrl.u32 %v4454_v56, 16  ;;  %v344_v11 = vsel %vm276_vm1, %v339_v58, %v343_v47  ;;  %v1478_v8 = vor.u32 %v1477_v60, %v1476_v59 }
  0x2a   : > { %5350 = vst [vmem:[#allocation3_spill] sm:$0xff] %v4466_v5  ;;  %v352_v12 = vsel %vm276_vm1, %v347_v61, %v351_v62  ;;  %v359_v20 = vrot.slane %v4442_v42, 1  ;;  %v1481_v24 = vrot.slane %v4466_v5, 2  ;;  %v355_v32 = vor.u32 %v4438_v37, %v351_v62 }
  0x2b   : > { %5351 = vst [vmem:[#allocation4_spill] sm:$0xff] %v4469_v10  ;;  %v1475_v19 = vsel %vm1440_vm2, %v1470_v39, %v1474_v1  ;;  %v1480_v21 = vrot.slane %v4469_v10, 1  ;;  %v1479_v29 = vsel %vm1440_vm2, %v1474_v1, %v1478_v8  ;;  %v367_v34 = vrot.slane %v4466_v5, 1 }
  0x2c   : > { %3561 = vmatmul.mubr.msk.bf16.gmra.mrb[8].mxu1 %vm425_vm3, %v328_v38  ;;  %v363_v33 = vor.u32 %v4445_v43, %v359_v20  ;;  %v4491_v38 = vld [vmem:[%s4292_s25 + $0x68] sm:$0xff]   ;;  %v4494_v39 = vshll.u32 %v4474_v13, 16  ;;  %v4506_v48 = vshll.u32 %v4482_v25, 16  ;;  %v1799_v58 = vrot.slane %v4298_v7, 2 }
  0x2d   : > { %3564 = vmatprep.mubr.msk.bf16.mxu1 %vm425_vm3, %v336_v45  ;;  %v4497_v45 = vcombine.low %v208_v27, %v208_v27  ;;  %v4503_v47 = vor.u32 %v1481_v24, %v1480_v21  ;;  %v1800_v59 = vrot.slane %v4302_v9, 2  ;;  %v4515_v62 = vshrl.u32 %v4482_v25, 16  ;;  %v4528_v21 = vld [vmem:[%s4292_s25 + $0x70] sm:$0xff]  }
  0x2e   : > { %3713 = vmatmul.mubr.msk.bf16.gmra.mrb[8].mxu0 %vm425_vm3, %v1467_v46  ;;  %v4500_v46 = vshrl.u32 %v4474_v13, 16  ;;  %5355 = vst [vmem:[#allocation8_spill] sm:$0xff] %v4506_v48  ;;  %v5318_v52 = vrot.slane %v4494_v39, 1  ;;  %v368_v61 = vsel %vm276_vm1, %v363_v33, %v367_v34  ;;  %v4518_v1 = vshll.u32 %v4491_v38, 16 }
  0x2f   : > { %3716 = vmatprep.mubr.msk.bf16.mxu0 %vm425_vm3, %v1471_v57  ;;  %5352 = vst [vmem:[#allocation5_spill] sm:$0xff] %v4497_v45  ;;  %5354 = vst [vmem:[#allocation7_spill] sm:$0xff] %v4503_v47  ;;  %v360_v57 = vsel %vm276_vm1, %v355_v32, %v359_v20  ;;  %v421_v60 = vshll.u32 %v4497_v45, 16  ;;  %v375_v20 = vrot.slane %v4506_v48, 1  ;;  %v1801_v24 = vsel %vm1798_vm4, %v1799_v58, %v1800_v59 }
  0x30   : > { %5353 = vst [vmem:[#allocation6_spill] sm:$0xff] %v4500_v46  ;;  %5356 = vst [vmem:[#allocation9_spill] sm:$0xff] %v4515_v62  ;;  %v4545_v58 = vshll.u32 %v4528_v21, 16  ;;  %v5366_v5 = vrot.slane %v4494_v39, 1  ;;  %v2349_v45 = vrot.slane %v4345_v40, 3  ;;  %v1814_v40 = vrot.slane %v4420_v23, 2 }
  0x31   : > { %5357 = vst [vmem:[#allocation10_spill] sm:$0xff] %v4518_v1  ;;  %v379_v33 = vor.u32 %v4515_v62, %v375_v20 }
  0x32   : > { %5358 = vst [vmem:[#allocation11_spill] sm:$0xff] %v4545_v58 }
  0x34   : > { %3565 = vmatmul.mubr.msk.bf16.gmra.mrb[12].mxu1 %vm425_vm3, %v344_v11  ;;  %v419_v11 = vor.u32 %v4500_v46, %v5318_v52  ;;  %v4554_v52 = vshrl.u32 %v4528_v21, 16 }
  0x35   : > { %3568 = vmatprep.mubr.msk.bf16.mxu1 %vm425_vm3, %v352_v12  ;;  %v423_v12 = vrot.slane %v421_v60, 1  ;;  %v1802_v60 = vrot.slane %v4316_v17, 2 }
  0x36   : > { %3717 = vmatmul.mubr.msk.bf16.gmra.mrb[12].mxu0 %vm425_vm3, %v1475_v19  ;;  %v1483_v19 = vsel %vm1440_vm2, %v1478_v8, %v4503_v47  ;;  %v4539_v8 = vld [vmem:[%s4292_s25 + $0x78] sm:$0xff]   ;;  %5360 = vst [vmem:[#allocation13_spill] sm:$0xff] %v4554_v52  ;;  %v4566_v47 = vld [vmem:[%s4292_s25 + $0x80] sm:$0xff]  }
  0x37   : > { %3720 = vmatprep.mubr.msk.bf16.mxu0 %vm425_vm3, %v1479_v29  ;;  %v371_v29 = vor.u32 %v4469_v10, %v367_v34  ;;  %v4534_v32 = vsel %vm276_vm1, %v419_v11, %v423_v12  ;;  %v4550_v11 = vshrl.u32 %v4491_v38, 16  ;;  %v2348_v10 = vrot.slane %v4354_v44, 2 }
  0x38   : > { %v2352_v44 = vrot.slane %v4375_v53, 2 }
  0x39   : > { %v376_v34 = vsel %vm276_vm1, %v371_v29, %v375_v20  ;;  %5359 = vst [vmem:[#allocation12_spill] sm:$0xff] %v4550_v11  ;;  %v4562_v20 = vsel %vm1798_vm4, %v1800_v59, %v1802_v60  ;;  %v391_v29 = vrot.slane %v4545_v58, 1  ;;  %v4582_v58 = vld [vmem:[%s5315_s1 + $0x1c] sm:$0xf] }
  0x3c   : > { %3569 = vmatmul.mubr.msk.bf16.gmra.mrb[16].mxu1 %vm425_vm3, %v360_v57  ;;  %v383_v57 = vrot.slane %v4518_v1, 1  ;;  %v395_v1 = vor.u32 %v4554_v52, %v391_v29  ;;  %v4602_v52 = vshrl.u32 %v4539_v8, 16 }
  0x3d   : > { %3572 = vmatprep.mubr.msk.bf16.mxu1 %vm425_vm3, %v368_v61  ;;  %v1804_v61 = vrot.slane %v4319_v18, 2 }
  0x3e   : > { %3721 = vmatmul.mubr.msk.bf16.gmra.mrb[16].mxu0 %vm425_vm3, %v1483_v19  ;;  %v384_v12 = vsel %vm276_vm1, %v379_v33, %v383_v57  ;;  %v4557_v19 = vshll.u32 %v4539_v8, 16  ;;  %v2123_v33 = vsel %vm480_vm0, %v4370_v51, 0  ;;  %v387_v2 = vor.u32 %v4550_v11, %v383_v57  ;;  %v4587_v51 = vld [vmem:[%s4292_s25 + $0x98] sm:$0xf]  ;;  %5364 = vst [vmem:[#allocation17_spill] sm:$0xff] %v4602_v52 }
  0x3f   : > { %3742 = vmatprep.mubr.msk.bf16.mxu0 %vm425_vm3, %v1801_v24  ;;  %v209_v24 = vld [vmem:[%s4292_s25 + $0x94] sm:$0xf]  ;;  %v4572_v46 = vsel %vm1798_vm4, %v1802_v60, %v1804_v61  ;;  %v211_v60 = vld [vmem:[%s4292_s25 + $0x9c] sm:$0xf]  ;;  %v1806_v57 = vrot.slane %v4331_v31, 2  ;;  %v4608_v11 = vshrl.u32 %v4566_v47, 16 }
  0x40   : > { %5361 = vst [vmem:[#allocation14_spill] sm:$0xff] %v4557_v19  ;;  %v4577_v59 = vcombine.low %v208_v27, %v209_v24  ;;  %v4594_v27 = vshll.u32 %v4566_v47, 16  ;;  %v392_v24 = vsel %vm276_vm1, %v387_v2, %v391_v29 }
  0x41   : > { %5365 = vst [vmem:[#allocation18_spill] sm:$0xff] %v4608_v11  ;;  %v4616_v2 = vsel %vm1798_vm4, %v1804_v61, %v1806_v57  ;;  %v2341_v61 = vrot.slane %v4313_v16, 2 }
  0x42   : > { %5362 = vst [vmem:[#allocation15_spill] sm:$0xff] %v4577_v59  ;;  %5363 = vst [vmem:[#allocation16_spill] sm:$0xff] %v4594_v27  ;;  %v4611_v48 = vrot.slane %v4577_v59, 2  ;;  %v407_v29 = vrot.slane %v4594_v27, 1  ;;  %v2342_v27 = vrot.slane %v4310_v15, 3 }
  0x44   : > { %3573 = vmatmul.mubr.msk.bf16.gmra.mrb[20].mxu1 %vm425_vm3, %v376_v34  ;;  %v399_v34 = vrot.slane %v4557_v19, 1  ;;  %v1808_v19 = vrot.slane %v4348_v41, 2 }
  0x45   : > { %3576 = vmatprep.mubr.msk.bf16.mxu1 %vm425_vm3, %v384_v12  ;;  %v4597_v12 = vcombine.low %v4587_v51, %v211_v60 }
  0x46   : > { %3743 = vmatmul.mubr.msk.bf16.vlgmr.msra.gmra.mrb[0].mxu0 %vm425_vm3, %v4562_v20  ;;  %v4627_v59 = vsel %vm1798_vm4, %v1806_v57, %v1808_v19  ;;  %v403_v62 = vor.u32 %v4602_v52, %v399_v34  ;;  %v2345_v57 = vrot.slane %v4325_v26, 3  ;;  %v2343_v52 = vor.u32 %v2342_v27, %v2341_v61 }
  0x47   : > { %3779 = vmatpush3.bf16.msra.mxu0 %v2123_v33  ;;  %3746 = vmatprep.mubr.msk.bf16.mxu0 %vm425_vm3, %v4572_v46  ;;  %v400_v33 = vsel %vm276_vm1, %v395_v1, %v399_v34  ;;  %v5341_v60 = vrot.slane %v4597_v12, 2  ;;  %v1820_v61 = vrot.slane %v4482_v25, 2 }
  0x48   : > { %4190 = vmatprep.subr.msk.bf16.mxu0 %vm480_vm0, %v4582_v58  ;;  %v408_v34 = vsel %vm276_vm1, %v403_v62, %v407_v29  ;;  %v2350_v62 = vor.u32 %v2349_v45, %v2348_v10  ;;  %v2353_v10 = vrot.slane %v4362_v49, 3  ;;  %v1816_v45 = vrot.slane %v4427_v28, 2 }
  0x49   : > { %v4623_v1 = vsel %vm1798_vm4, %v4611_v48, %v5341_v60  ;;  %v1810_v60 = vrot.slane %v4365_v50, 2 }
  0x4a   : > { %v4682_v49 = vsel %vm1798_vm4, %v1814_v40, %v1816_v45 }
  0x4c   : > { %3577 = vmatmul.mubr.msk.bf16.gmra.mrb[24].mxu1 %vm425_vm3, %v392_v24  ;;  %v411_v24 = vor.u32 %v4608_v11, %v407_v29  ;;  %v1812_v11 = vrot.slane %v4393_v63, 2 }
  0x4d   : > { %3580 = vmatprep.mubr.msk.bf16.mxu1 %vm425_vm3, %v400_v33  ;;  %v2344_v33 = vrot.slane %v4328_v30, 2  ;;  %v4649_v30 = vsel %vm1798_vm4, %v1808_v19, %v1810_v60  ;;  %v2356_v19 = vrot.slane %v4381_v55, 2  ;;  %v2360_v55 = vrot.slane %v4400_v4, 2  ;;  %v4702_v4 = vld [vmem:[%s5315_s1 + $0xc] sm:$0xf] }
  0x4e   : > { %3747 = vmatmul.mubr.msk.bf16.gmra.mrb[4].mxu0 %vm425_vm3, %v4616_v2  ;;  %v416_v16 = vsel %vm276_vm1, %v411_v24, %v5366_v5  ;;  %v4656_v27 = vsel %vm1798_vm4, %v1810_v60, %v1812_v11  ;;  %v2357_v60 = vrot.slane %v4378_v54, 3  ;;  %v4674_v29 = vsel %vm1798_vm4, %v1812_v11, %v1814_v40 }
  0x4f   : > { %3750 = vmatprep.mubr.msk.bf16.mxu0 %vm425_vm3, %v4627_v59  ;;  %v2346_v15 = vor.u32 %v2345_v57, %v2344_v33  ;;  %v1818_v11 = vrot.slane %v4454_v56, 2  ;;  %v991_v57 = vsel %vm480_vm0, %v4339_v36, 0  ;;  %v2369_v40 = vrot.slane %v4435_v35, 3 }
  0x50   : > { %v2358_v53 = vor.u32 %v2357_v60, %v2356_v19  ;;  %v2373_v19 = vrot.slane %v4442_v42, 3 }
  0x51   : > { %v4652_v26 = vsel %vm2340_vm5, %v2343_v52, %v2346_v15  ;;  %v4659_v5 = vsel %vm2340_vm5, %v2346_v15, %v2350_v62  ;;  %v2354_v52 = vor.u32 %v2353_v10, %v2352_v44  ;;  %v4710_v15 = vsel %vm1798_vm4, %v1816_v45, %v1818_v11 }
  0x52   : > { %v4715_v36 = vsel %vm1798_vm4, %v1818_v11, %v1820_v61  ;;  %v1822_v44 = vrot.slane %v4491_v38, 2  ;;  %v1824_v10 = vrot.slane %v4528_v21, 2 }
  0x53   : > { %v4677_v24 = vsel %vm2340_vm5, %v2350_v62, %v2354_v52  ;;  %v4687_v54 = vsel %vm2340_vm5, %v2354_v52, %v2358_v53  ;;  %v2372_v52 = vrot.slane %v4445_v43, 2  ;;  %v1826_v43 = vrot.slane %v4539_v8, 2 }
  0x54   : > { %3581 = vmatmul.mubr.msk.bf16.gmra.mrb[28].mxu1 %vm425_vm3, %v408_v34  ;;  %v2364_v34 = vrot.slane %v4417_v22, 2  ;;  %v2368_v22 = vrot.slane %v4438_v37, 2  ;;  %v4738_v35 = vsel %vm1798_vm4, %v1820_v61, %v1822_v44  ;;  %v1830_v61 = vrot.slane %v4474_v13, 2 }
  0x55   : > { %3584 = vmatprep.mubr.msk.bf16.mxu1 %vm425_vm3, %v416_v16  ;;  %v2365_v16 = vrot.slane %v4410_v14, 3  ;;  %v4740_v37 = vor.u32 %v2373_v19, %v2372_v52  ;;  %v4907_v52 = vld [vmem:[%s4292_s25 + $0xa0] ss:$0 sps:$4 sm:$0xff]   ;;  %v918_v19 = vrot.slane %v4427_v28, 1 }
  0x56   : > { %3751 = vmatmul.mubr.msk.bf16.gmra.mrb[8].mxu0 %vm425_vm3, %v4649_v30  ;;  %v2370_v45 = vor.u32 %v2369_v40, %v2368_v22  ;;  %v914_v40 = vrot.slane %v4393_v63, 1 }
  0x57   : > { %3754 = vmatprep.mubr.msk.bf16.mxu0 %vm425_vm3, %v4656_v27  ;;  %v2366_v62 = vor.u32 %v2365_v16, %v2364_v34  ;;  %v4785_v34 = vsel %vm1798_vm4, %v1830_v61, %v4611_v48 }
  0x58   : > { %v4749_v42 = vsel %vm2340_vm5, %v2370_v45, %v4740_v37 }
  0x59   : > { %v4733_v60 = vsel %vm2340_vm5, %v2366_v62, %v2370_v45 }
  0x5c   : > { %3585 = vmatmul.mubr.msk.bf16.gmra.mrb[32].mxu1 %vm425_vm3, %v4534_v32  ;;  %v2361_v32 = vrot.slane %v4397_v3, 3 }
  0x5d   : > { %3590 = vmatprep.mubr.msk.bf16.mxu1 %vm425_vm3, %v4295_v6 }
  0x5e   : > { %3755 = vmatmul.mubr.msk.bf16.gmra.mrb[12].mxu0 %vm425_vm3, %v4674_v29  ;;  %v2362_v33 = vor.u32 %v2361_v32, %v2360_v55  ;;  %v1828_v55 = vrot.slane %v4566_v47, 2  ;;  %v4760_v32 = vsel %vm1798_vm4, %v1824_v10, %v1826_v43 }
  0x5f   : > { %3758 = vmatprep.mubr.msk.bf16.mxu0 %vm425_vm3, %v4682_v49 }
  0x60   : > { %v4705_v3 = vsel %vm2340_vm5, %v2358_v53, %v2362_v33  ;;  %v4720_v14 = vsel %vm2340_vm5, %v2362_v33, %v2366_v62  ;;  %v4745_v53 = vsel %vm1798_vm4, %v1822_v44, %v1824_v10  ;;  %v4765_v11 = vsel %vm1798_vm4, %v1826_v43, %v1828_v55 }
  0x61   : > { %v4775_v33 = vsel %vm1798_vm4, %v1828_v55, %v1830_v61  ;;  %v2481_v62 = vsel %vm480_vm0, %v4582_v58, 0  ;;  %v900_v58 = vrot.slane %v4298_v7, 1  ;;  %v916_v44 = vrot.slane %v4420_v23, 1 }
  0x62   : > { %v924_v61 = vrot.slane %v4491_v38, 1 }
  0x63   : > { %v4902_v45 = vsel %vm898_vm6, %v914_v40, %v916_v44  ;;  %v4919_v43 = vsel %vm898_vm6, %v916_v44, %v918_v19 }
  0x64   : > { %3591 = vmatmul.mubr.msk.bf16.vlgmr.msra.gmra.mrb[0].mxu1 %vm425_vm3, %v4298_v7 }
  0x65   : > { %3594 = vmatprep.mubr.msk.bf16.mxu1 %vm425_vm3, %v4302_v9  ;;  %3627 = vmatpush3.bf16.msra.mxu1 %v991_v57  ;;  %v4779_v57 = vcombine.low %v4587_v51, %v4587_v51 }
  0x66   : > { %4185 = vmatprep.subr.msk.bf16.mxu1 %vm480_vm0, %v4702_v4  ;;  %3759 = vmatmul.mubr.msk.bf16.gmra.mrb[16].mxu0 %vm425_vm3, %v4710_v15 }
  0x67   : > { %3762 = vmatprep.mubr.msk.bf16.mxu0 %vm425_vm3, %v4715_v36  ;;  %v1834_v16 = vrot.slane %v4779_v57, 2 }
  0x69   : > { %v1835_v51 = vsel %vm1798_vm4, %v4611_v48, %v1834_v16  ;;  %v4810_v48 = vld [vmem:[%s5315_s1 + $0x20] sm:$0xf] }
  0x6a   : > { %v2791_v16 = vsel %vm480_vm0, %v4810_v48, 0 }
  0x6c   : > { %3595 = vmatmul.mubr.msk.bf16.gmra.mrb[4].mxu1 %vm425_vm3, %v4316_v17 }
  0x6d   : > { %3598 = vmatprep.mubr.msk.bf16.mxu1 %vm425_vm3, %v4319_v18 }
  0x6e   : > { %3763 = vmatmul.mubr.msk.bf16.gmra.mrb[20].mxu0 %vm425_vm3, %v4738_v35 }
  0x6f   : > { %3766 = vmatprep.mubr.msk.bf16.mxu0 %vm425_vm3, %v4745_v53 }
  0x74   : > { %3599 = vmatmul.mubr.msk.bf16.gmra.mrb[8].mxu1 %vm425_vm3, %v4331_v31 }
  0x75   : > { %3602 = vmatprep.mubr.msk.bf16.mxu1 %vm425_vm3, %v4348_v41 }
  0x76   : > { %3767 = vmatmul.mubr.msk.bf16.gmra.mrb[24].mxu0 %vm425_vm3, %v4760_v32 }
  0x77   : > { %3770 = vmatprep.mubr.msk.bf16.mxu0 %vm425_vm3, %v4765_v11 }
  0x7c   : > { %3603 = vmatmul.mubr.msk.bf16.gmra.mrb[12].mxu1 %vm425_vm3, %v4365_v50 }
  0x7d   : > { %3606 = vmatprep.mubr.msk.bf16.mxu1 %vm425_vm3, %v4393_v63 }
  0x7e   : > { %3771 = vmatmul.mubr.msk.bf16.gmra.mrb[28].mxu0 %vm425_vm3, %v4775_v33 }
  0x7f   : > { %3774 = vmatprep.mubr.msk.bf16.mxu0 %vm425_vm3, %v4785_v34 }
  0x84   : > { %3607 = vmatmul.mubr.msk.bf16.gmra.mrb[16].mxu1 %vm425_vm3, %v4420_v23 }
  0x85   : > { %3610 = vmatprep.mubr.msk.bf16.mxu1 %vm425_vm3, %v4427_v28 }
  0x86   : > { %3775 = vmatmul.mubr.msk.bf16.gmra.mrb[32].mxu0 %vm425_vm3, %v1835_v51  ;;  %v926_v51 = vrot.slane %v4528_v21, 1 }
  0x87   : > { %3780 = vmatprep.mubr.msk.bf16.mxu0 %vm425_vm3, %v4562_v20 }
  0x8c   : > { %3611 = vmatmul.mubr.msk.bf16.gmra.mrb[20].mxu1 %vm425_vm3, %v4454_v56 }
  0x8d   : > { %3614 = vmatprep.mubr.msk.bf16.mxu1 %vm425_vm3, %v4482_v25 }
  0x8e   : > { %3781 = vmatmul.mubr.msk.bf16.vlgmr.msra.gmra.mrb[0].mxu0 %vm425_vm3, %v4572_v46  ;;  %v899_v46 = vrot.slane %v4295_v6, 1  ;;  %v904_v6 = vrot.slane %v4316_v17, 1 }
  0x8f   : > { %3817 = vmatpush3.bf16.msra.mxu0 %v2481_v62  ;;  %3784 = vmatprep.mubr.msk.bf16.mxu0 %vm425_vm3, %v4616_v2  ;;  %v928_v62 = vrot.slane %v4539_v8, 1 }
  0x90   : > { %4191 = vmatprep.subr.msk.bf16.mxu0 %vm480_vm0, %v4810_v48  ;;  %v901_v20 = vsel %vm898_vm6, %v899_v46, %v900_v58  ;;  %v930_v48 = vrot.slane %v4566_v47, 1 }
  0x91   : > { %v4958_v46 = vsel %vm898_vm6, %v926_v51, %v928_v62 }
  0x94   : > { %3615 = vmatmul.mubr.msk.bf16.gmra.mrb[24].mxu1 %vm425_vm3, %v4491_v38 }
  0x95   : > { %3618 = vmatprep.mubr.msk.bf16.mxu1 %vm425_vm3, %v4528_v21 }
  0x96   : > { %3785 = vmatmul.mubr.msk.bf16.gmra.mrb[4].mxu0 %vm425_vm3, %v4627_v59  ;;  %v902_v59 = vrot.slane %v4302_v9, 1 }
  0x97   : > { %3788 = vmatprep.mubr.msk.bf16.mxu0 %vm425_vm3, %v4649_v30  ;;  %v1223_v30 = vsel %vm480_vm0, %v4702_v4, 0 }
  0x98   : > { %v4847_v7 = vsel %vm898_vm6, %v900_v58, %v902_v59  ;;  %v4850_v2 = vsel %vm898_vm6, %v902_v59, %v904_v6 }
  0x9c   : > { %3619 = vmatmul.mubr.msk.bf16.gmra.mrb[28].mxu1 %vm425_vm3, %v4539_v8 }
  0x9d   : > { %3622 = vmatprep.mubr.msk.bf16.mxu1 %vm425_vm3, %v4566_v47 }
  0x9e   : > { %3789 = vmatmul.mubr.msk.bf16.gmra.mrb[8].mxu0 %vm425_vm3, %v4656_v27  ;;  %v906_v27 = vrot.slane %v4319_v18, 1 }
  0x9f   : > { %3792 = vmatprep.mubr.msk.bf16.mxu0 %vm425_vm3, %v4674_v29  ;;  %v908_v29 = vrot.slane %v4331_v31, 1 }
  0xa1   : > { %v4870_v4 = vsel %vm898_vm6, %v906_v27, %v908_v29 }
  0xa4   : > { %3623 = vmatmul.mubr.msk.bf16.gmra.mrb[32].mxu1 %vm425_vm3, %v4474_v13 }
  0xa5   : > { %3628 = vmatprep.mubr.msk.bf16.mxu1 %vm425_vm3, %v901_v20  ;;  %v5368_v20 = vld [vmem:[#allocation5_spill] sm:$0xff] }
  0xa6   : > { %3793 = vmatmul.mubr.msk.bf16.gmra.mrb[12].mxu0 %vm425_vm3, %v4682_v49  ;;  %v4867_v49 = vsel %vm898_vm6, %v904_v6, %v906_v27  ;;  %v934_v59 = vrot.slane %v5368_v20, 1  ;;  %v5369_v6 = vld [vmem:[#allocation4_spill] sm:$0xff]  ;;  %v5379_v20 = vld [vmem:[#allocation14_spill] sm:$0xff] }
  0xa7   : > { %3796 = vmatprep.mubr.msk.bf16.mxu0 %vm425_vm3, %v4710_v15  ;;  %v912_v15 = vrot.slane %v4365_v50, 1 }
  0xa9   : > { %v4899_v10 = vsel %vm898_vm6, %v912_v15, %v914_v40  ;;  %v5372_v40 = vld [vmem:[#allocation8_spill] sm:$0xff] }
  0xaa   : > { %v2381_v44 = vrot.slane %v5372_v40, 3 }
  0xac   : > { %3629 = vmatmul.mubr.msk.bf16.vlgmr.msra.gmra.mrb[0].mxu1 %vm425_vm3, %v4847_v7 }
  0xad   : > { %3632 = vmatprep.mubr.msk.bf16.mxu1 %vm425_vm3, %v4850_v2  ;;  %3665 = vmatpush3.bf16.msra.mxu1 %v1223_v30  ;;  %v5370_v30 = vld [vmem:[#allocation3_spill] sm:$0xff] }
  0xae   : > { %4187 = vmatprep.subr.msk.bf16.mxu1 %vm480_vm0, %v4264_v0  ;;  %3797 = vmatmul.mubr.msk.bf16.gmra.mrb[16].mxu0 %vm425_vm3, %v4715_v36  ;;  %v910_v0 = vrot.slane %v4348_v41, 1  ;;  %v2377_v27 = vrot.slane %v5370_v30, 3 }
  0xaf   : > { %3800 = vmatprep.mubr.msk.bf16.mxu0 %vm425_vm3, %v4738_v35  ;;  %v920_v35 = vrot.slane %v4454_v56, 1 }
  0xb0   : > { %v4883_v36 = vsel %vm898_vm6, %v908_v29, %v910_v0  ;;  %v4886_v22 = vsel %vm898_vm6, %v910_v0, %v912_v15  ;;  %v5371_v0 = vld [vmem:[#allocation9_spill] sm:$0xff] }
  0xb1   : > { %v4922_v55 = vsel %vm898_vm6, %v918_v19, %v920_v35  ;;  %v2380_v15 = vrot.slane %v5371_v0, 2 }
  0xb4   : > { %3633 = vmatmul.mubr.msk.bf16.gmra.mrb[4].mxu1 %vm425_vm3, %v4867_v49 }
  0xb5   : > { %3636 = vmatprep.mubr.msk.bf16.mxu1 %vm425_vm3, %v4870_v4 }
  0xb6   : > { %3801 = vmatmul.mubr.msk.bf16.gmra.mrb[20].mxu0 %vm425_vm3, %v4745_v53  ;;  %v2114_v53 = vrot.slane %v4907_v52, 2 }
  0xb7   : > { %3804 = vmatprep.mubr.msk.bf16.mxu0 %vm425_vm3, %v4760_v32  ;;  %v5367_v32 = vrot.slane %v4597_v12, 2 }
  0xbc   : > { %3637 = vmatmul.mubr.msk.bf16.gmra.mrb[8].mxu1 %vm425_vm3, %v4883_v36 }
  0xbd   : > { %3640 = vmatprep.mubr.msk.bf16.mxu1 %vm425_vm3, %v4886_v22 }
  0xbe   : > { %3805 = vmatmul.mubr.msk.bf16.gmra.mrb[24].mxu0 %vm425_vm3, %v4765_v11  ;;  %v2115_v11 = vsel %vm1798_vm4, %v5367_v32, %v2114_v53  ;;  %v5374_v53 = vld [vmem:[#allocation10_spill] sm:$0xff]  ;;  %v2382_v32 = vor.u32 %v2381_v44, %v2380_v15 }
  0xbf   : > { %3808 = vmatprep.mubr.msk.bf16.mxu0 %vm425_vm3, %v4775_v33  ;;  %v5382_v15 = vld [vmem:[#allocation6_spill] sm:$0xff] }
  0xc0   : > { %v2400_v44 = vrot.slane %v5382_v15, 2 }
  0xc4   : > { %3641 = vmatmul.mubr.msk.bf16.gmra.mrb[12].mxu1 %vm425_vm3, %v4899_v10 }
  0xc5   : > { %3644 = vmatprep.mubr.msk.bf16.mxu1 %vm425_vm3, %v4902_v45 }
  0xc6   : > { %3809 = vmatmul.mubr.msk.bf16.gmra.mrb[28].mxu0 %vm425_vm3, %v4785_v34 }
  0xc7   : > { %3812 = vmatprep.mubr.msk.bf16.mxu0 %vm425_vm3, %v4623_v1  ;;  %v922_v1 = vrot.slane %v4482_v25, 1 }
  0xc9   : > { %v4937_v33 = vsel %vm898_vm6, %v920_v35, %v922_v1  ;;  %v4940_v34 = vsel %vm898_vm6, %v922_v1, %v924_v61 }
  0xcc   : > { %3645 = vmatmul.mubr.msk.bf16.gmra.mrb[16].mxu1 %vm425_vm3, %v4919_v43 }
  0xcd   : > { %3648 = vmatprep.mubr.msk.bf16.mxu1 %vm425_vm3, %v4922_v55 }
  0xce   : > { %3813 = vmatmul.mubr.msk.bf16.gmra.mrb[32].mxu0 %vm425_vm3, %v2115_v11 }
  0xcf   : > { %3818 = vmatprep.mubr.msk.bf16.mxu0 %vm425_vm3, %v4652_v26  ;;  %v4955_v26 = vsel %vm898_vm6, %v924_v61, %v926_v51 }
  0xd4   : > { %3649 = vmatmul.mubr.msk.bf16.gmra.mrb[20].mxu1 %vm425_vm3, %v4937_v33 }
  0xd5   : > { %3652 = vmatprep.mubr.msk.bf16.mxu1 %vm425_vm3, %v4940_v34 }
  0xd6   : > { %3819 = vmatmul.mubr.msk.bf16.vlgmr.msra.gmra.mrb[0].mxu0 %vm425_vm3, %v4659_v5  ;;  %v4966_v5 = vrot.slane %v4474_v13, 1 }
  0xd7   : > { %3855 = vmatpush3.bf16.msra.mxu0 %v2791_v16  ;;  %3822 = vmatprep.mubr.msk.bf16.mxu0 %vm425_vm3, %v4677_v24  ;;  %v4973_v24 = vsel %vm898_vm6, %v928_v62, %v930_v48  ;;  %v5376_v16 = vld [vmem:[#allocation11_spill] sm:$0xff]  ;;  %v5377_v62 = vld [vmem:[#allocation2_spill] sm:$0xff] }
  0xd8   : > { %v4977_v58 = vsel %vm898_vm6, %v930_v48, %v4966_v5 }
  0xdc   : > { %3653 = vmatmul.mubr.msk.bf16.gmra.mrb[24].mxu1 %vm425_vm3, %v4955_v26 }
  0xdd   : > { %3656 = vmatprep.mubr.msk.bf16.mxu1 %vm425_vm3, %v4958_v46 }
  0xde   : > { %3823 = vmatmul.mubr.msk.bf16.gmra.mrb[4].mxu0 %vm425_vm3, %v4687_v54  ;;  %v2376_v54 = vrot.slane %v5369_v6, 2 }
  0xdf   : > { %3826 = vmatprep.mubr.msk.bf16.mxu0 %vm425_vm3, %v4705_v3  ;;  %v935_v3 = vsel %vm898_vm6, %v4966_v5, %v934_v59  ;;  %v2393_v59 = vrot.slane %v5379_v20, 3 }
  0xe0   : > { %v2378_v29 = vor.u32 %v2377_v27, %v2376_v54  ;;  %v5381_v27 = vld [vmem:[#allocation16_spill] sm:$0xff] }
  0xe2   : > { %v2379_v19 = vsel %vm2340_vm5, %v4740_v37, %v2378_v29  ;;  %v2383_v1 = vsel %vm2340_vm5, %v2378_v29, %v2382_v32  ;;  %v2389_v37 = vrot.slane %v5376_v16, 3 }
  0xe4   : > { %3657 = vmatmul.mubr.msk.bf16.gmra.mrb[28].mxu1 %vm425_vm3, %v4973_v24 }
  0xe5   : > { %3660 = vmatprep.mubr.msk.bf16.mxu1 %vm425_vm3, %v4977_v58 }
  0xe6   : > { %3827 = vmatmul.mubr.msk.bf16.gmra.mrb[8].mxu0 %vm425_vm3, %v4720_v14  ;;  %v5373_v14 = vld [vmem:[#allocation12_spill] sm:$0xff] }
  0xe7   : > { %3830 = vmatprep.mubr.msk.bf16.mxu0 %vm425_vm3, %v4733_v60  ;;  %v2384_v35 = vrot.slane %v5373_v14, 2  ;;  %v2385_v60 = vrot.slane %v5374_v53, 3 }
  0xe9   : > { %v2386_v11 = vor.u32 %v2385_v60, %v2384_v35  ;;  %v5383_v35 = vld [vmem:[#allocation15_spill] sm:$0xff] }
  0xea   : > { %v1509_v60 = vshrl.u32 %v5383_v35, 16 }
  0xeb   : > { %v2387_v51 = vsel %vm2340_vm5, %v2382_v32, %v2386_v11  ;;  %v1512_v32 = vshll.u32 %v5383_v35, 16 }
  0xec   : > { %3661 = vmatmul.mubr.msk.bf16.gmra.mrb[32].mxu1 %vm425_vm3, %v935_v3  ;;  %v2397_v3 = vrot.slane %v5381_v27, 3 }
  0xed   : > { %3666 = vmatprep.mubr.msk.bf16.mxu1 %vm425_vm3, %v4847_v7  ;;  %v5375_v7 = vld [vmem:[#allocation13_spill] sm:$0xff] }
  0xee   : > { %3831 = vmatmul.mubr.msk.bf16.gmra.mrb[12].mxu0 %vm425_vm3, %v4749_v42  ;;  %v2388_v61 = vrot.slane %v5375_v7, 2  ;;  %v5378_v42 = vld [vmem:[#allocation17_spill] sm:$0xff] }
  0xef   : > { %3834 = vmatprep.mubr.msk.bf16.mxu0 %vm425_vm3, %v2379_v19  ;;  %v2392_v48 = vrot.slane %v5378_v42, 2  ;;  %v2401_v19 = vrot.slane %v4494_v39, 3 }
  0xf1   : > { %v2394_v6 = vor.u32 %v2393_v59, %v2392_v48 }
  0xf4   : > { %3667 = vmatmul.mubr.msk.bf16.vlgmr.msra.gmra.mrb[0].mxu1 %vm425_vm3, %v4850_v2  ;;  %v2390_v2 = vor.u32 %v2389_v37, %v2388_v61  ;;  %v2404_v37 = vrot.slane %v1509_v60, 2 }
  0xf5   : > { %3670 = vmatprep.mubr.msk.bf16.mxu1 %vm425_vm3, %v4867_v49  ;;  %3893 = vmatpush3.bf16.msra.mxu1 %v5377_v62  ;;  %v5380_v49 = vld [vmem:[#allocation18_spill] sm:$0xff] }
  0xf6   : > { %3835 = vmatmul.mubr.msk.bf16.gmra.mrb[16].mxu0 %vm425_vm3, %v2383_v1  ;;  %v2391_v54 = vsel %vm2340_vm5, %v2386_v11, %v2390_v2  ;;  %v2396_v30 = vrot.slane %v5380_v49, 2  ;;  %v2395_v29 = vsel %vm2340_vm5, %v2390_v2, %v2394_v6  ;;  %v2402_v11 = vor.u32 %v2401_v19, %v2400_v44 }
  0xf7   : > { %3838 = vmatprep.mubr.msk.bf16.mxu0 %vm425_vm3, %v2387_v51  ;;  %v2409_v1 = vshrl.u32 %v4597_v12, 16  ;;  %v2405_v51 = vrot.slane %v1512_v32, 3  ;;  %v2418_v2 = vshrl.u32 %v4907_v52, 16  ;;  %v2699_v19 = vrot.slane %v4302_v9, 3 }
  0xf8   : > { %v2704_v9 = vrot.slane %v4331_v31, 3 }
  0xf9   : > { %v2411_v48 = vrot.slane %v2409_v1, 2  ;;  %v1484_v1 = vrot.slane %v5371_v0, 1  ;;  %v2716_v0 = vrot.slane %v4454_v56, 3 }
  0xfc   : > { %3671 = vmatmul.mubr.msk.bf16.gmra.mrb[4].mxu1 %vm425_vm3, %v4870_v4  ;;  %v2398_v4 = vor.u32 %v2397_v3, %v2396_v30 }
  0xfd   : > { %3674 = vmatprep.mubr.msk.bf16.mxu1 %vm425_vm3, %v4883_v36  ;;  %v2412_v36 = vshll.u32 %v4597_v12, 16 }
  0xfe   : > { %3839 = vmatmul.mubr.msk.bf16.gmra.mrb[20].mxu0 %vm425_vm3, %v2391_v54  ;;  %v2399_v61 = vsel %vm2340_vm5, %v2394_v6, %v2398_v4  ;;  %v2403_v62 = vsel %vm2340_vm5, %v2398_v4, %v2402_v11  ;;  %v2421_v6 = vshll.u32 %v4907_v52, 16  ;;  %v2700_v4 = vrot.slane %v4316_v17, 3 }
  0xff   : > { %3842 = vmatprep.mubr.msk.bf16.mxu0 %vm425_vm3, %v2395_v29  ;;  %v2414_v59 = vrot.slane %v2412_v36, 3  ;;  %v1485_v36 = vrot.slane %v5372_v40, 2  ;;  %v1489_v40 = vrot.slane %v5374_v53, 2 }
 0x100   : > { %v2423_v3 = vrot.slane %v2421_v6, 3  ;;  %v1497_v6 = vrot.slane %v5379_v20, 2 }
 0x101   : > { %v2415_v54 = vor.u32 %v2414_v59, %v2411_v48  ;;  %v1492_v48 = vrot.slane %v5375_v7, 1  ;;  %v1493_v59 = vrot.slane %v5376_v16, 2  ;;  %v2720_v7 = vrot.slane %v4491_v38, 3 }
 0x102   : > { %v1496_v16 = vrot.slane %v5378_v42, 1  ;;  %v2722_v42 = vrot.slane %v4528_v21, 3 }
 0x104   : > { %3675 = vmatmul.mubr.msk.bf16.gmra.mrb[8].mxu1 %vm425_vm3, %v4886_v22  ;;  %v2406_v22 = vor.u32 %v2405_v51, %v2404_v37  ;;  %v1486_v37 = vor.u32 %v1485_v36, %v1484_v1  ;;  %v5384_v51 = vld [vmem:[#allocation7_spill] sm:$0xff]  ;;  %v2723_v21 = vsel %vm2698_vm7, %v2720_v7, %v2722_v42 }
 0x105   : > { %3678 = vmatprep.mubr.msk.bf16.mxu1 %vm425_vm3, %v4899_v10  ;;  %v2420_v10 = vrot.slane %v2418_v2, 2  ;;  %v1494_v2 = vor.u32 %v1493_v59, %v1492_v48 }
 0x106   : > { %3843 = vmatmul.mubr.msk.bf16.gmra.mrb[24].mxu0 %vm425_vm3, %v2399_v61  ;;  %v2407_v30 = vsel %vm2340_vm5, %v2402_v11, %v2406_v22  ;;  %v2416_v29 = vsel %vm2340_vm5, %v2406_v22, %v2415_v54  ;;  %v2702_v11 = vrot.slane %v4319_v18, 3  ;;  %v2708_v18 = vrot.slane %v4365_v50, 3 }
 0x107   : > { %3846 = vmatprep.mubr.msk.bf16.mxu0 %vm425_vm3, %v2403_v62  ;;  %v2424_v44 = vor.u32 %v2423_v3, %v2420_v10  ;;  %v2712_v50 = vrot.slane %v4420_v23, 3  ;;  %v2714_v23 = vrot.slane %v4427_v28, 3  ;;  %v1487_v62 = vsel %vm1440_vm2, %v5384_v51, %v1486_v37 }
 0x108   : > { %v2703_v17 = vsel %vm2698_vm7, %v2700_v4, %v2702_v11  ;;  %v1501_v10 = vrot.slane %v5381_v27, 2  ;;  %v1504_v27 = vrot.slane %v5382_v15, 1  ;;  %v1518_v15 = vshrl.u32 %v4779_v57, 16 }
 0x109   : > { %v2715_v22 = vsel %vm2698_vm7, %v2712_v50, %v2714_v23  ;;  %v2717_v28 = vsel %vm2698_vm7, %v2714_v23, %v2716_v0 }
 0x10c   : > { %3679 = vmatmul.mubr.msk.bf16.gmra.mrb[12].mxu1 %vm425_vm3, %v4902_v45  ;;  %v2425_v45 = vsel %vm2340_vm5, %v2415_v54, %v2424_v44  ;;  %v1505_v44 = vrot.slane %v4494_v39, 2  ;;  %v1521_v39 = vshll.u32 %v4779_v57, 16 }
 0x10d   : > { %3682 = vmatprep.mubr.msk.bf16.mxu1 %vm425_vm3, %v4919_v43  ;;  %v2701_v43 = vsel %vm2698_vm7, %v2699_v19, %v2700_v4  ;;  %v1511_v4 = vrot.slane %v1509_v60, 1  ;;  %v2726_v60 = vrot.slane %v4566_v47, 3  ;;  %v2730_v47 = vrot.slane %v5383_v35, 3 }
 0x10e   : > { %3847 = vmatmul.mubr.msk.bf16.gmra.mrb[28].mxu0 %vm425_vm3, %v2407_v30  ;;  %v1500_v30 = vrot.slane %v5380_v49, 1  ;;  %v2724_v49 = vrot.slane %v4539_v8, 3 }
 0x10f   : > { %3850 = vmatprep.mubr.msk.bf16.mxu0 %vm425_vm3, %v2416_v29  ;;  %v1498_v29 = vor.u32 %v1497_v6, %v1496_v16 }
 0x110   : > { %v1502_v38 = vor.u32 %v1501_v10, %v1500_v30  ;;  %v2725_v8 = vsel %vm2698_vm7, %v2722_v42, %v2724_v49 }
 0x111   : > { %v1499_v20 = vsel %vm1440_vm2, %v1494_v2, %v1498_v29 }
 0x112   : > { %v1503_v19 = vsel %vm1440_vm2, %v1498_v29, %v1502_v38 }
 0x114   : > { %3683 = vmatmul.mubr.msk.bf16.gmra.mrb[16].mxu1 %vm425_vm3, %v4922_v55  ;;  %v2705_v55 = vsel %vm2698_vm7, %v2702_v11, %v2704_v9 }
 0x115   : > { %3686 = vmatprep.mubr.msk.bf16.mxu1 %vm425_vm3, %v4937_v33  ;;  %v2706_v33 = vrot.slane %v4348_v41, 3  ;;  %v2710_v41 = vrot.slane %v4393_v63, 3  ;;  %v1214_v63 = vrot.slane %v4779_v57, 1 }
 0x116   : > { %3851 = vmatmul.mubr.msk.bf16.gmra.mrb[32].mxu0 %vm425_vm3, %v2425_v45  ;;  %v1514_v45 = vrot.slane %v1512_v32, 2 }
 0x117   : > { %3856 = vmatprep.mubr.msk.bf16.mxu0 %vm425_vm3, %v2701_v43  ;;  %v2707_v31 = vsel %vm2698_vm7, %v2704_v9, %v2706_v33  ;;  %v2713_v61 = vsel %vm2698_vm7, %v2710_v41, %v2712_v50  ;;  %v1506_v43 = vor.u32 %v1505_v44, %v1504_v27  ;;  %v2728_v9 = vrot.slane %v4474_v13, 3 }
 0x118   : > { %v1515_v11 = vor.u32 %v1514_v45, %v1511_v4  ;;  %v2734_v50 = vrot.slane %v4907_v52, 3 }
 0x119   : > { %v1507_v32 = vsel %vm1440_vm2, %v1502_v38, %v1506_v43  ;;  %v2729_v57 = vsel %vm2698_vm7, %v2726_v60, %v2728_v9 }
 0x11c   : > { %3687 = vmatmul.mubr.msk.bf16.gmra.mrb[20].mxu1 %vm425_vm3, %v4940_v34  ;;  %v2709_v34 = vsel %vm2698_vm7, %v2706_v33, %v2708_v18  ;;  %v1516_v33 = vsel %vm1440_vm2, %v1506_v43, %v1515_v11 }
 0x11d   : > { %3690 = vmatprep.mubr.msk.bf16.mxu1 %vm425_vm3, %v4955_v26  ;;  %v1212_v26 = vrot.slane %v5383_v35, 1 }
 0x11e   : > { %3857 = vmatmul.mubr.msk.bf16.vlgmr.msra.gmra.mrb[0].mxu0 %vm425_vm3, %v2703_v17  ;;  %v1520_v17 = vrot.slane %v1518_v15, 1 }
 0x11f   : > { %3860 = vmatprep.mubr.msk.bf16.mxu0 %vm425_vm3, %v2705_v55  ;;  %v1523_v55 = vrot.slane %v1521_v39, 2 }
 0x124   : > { %3691 = vmatmul.mubr.msk.bf16.gmra.mrb[24].mxu1 %vm425_vm3, %v4958_v46  ;;  %v1213_v46 = vsel %vm898_vm6, %v4966_v5, %v1212_v26  ;;  %v1215_v5 = vsel %vm898_vm6, %v1212_v26, %v1214_v63  ;;  %v2731_v26 = vsel %vm2698_vm7, %v2728_v9, %v2730_v47 }
 0x125   : > { %3694 = vmatprep.mubr.msk.bf16.mxu1 %vm425_vm3, %v4973_v24  ;;  %v2711_v24 = vsel %vm2698_vm7, %v2708_v18, %v2710_v41  ;;  %v2727_v18 = vsel %vm2698_vm7, %v2724_v49, %v2726_v60 }
 0x126   : > { %3861 = vmatmul.mubr.msk.bf16.gmra.mrb[4].mxu0 %vm425_vm3, %v2707_v31  ;;  %v1524_v31 = vor.u32 %v1523_v55, %v1520_v17 }
 0x127   : > { %3864 = vmatprep.mubr.msk.bf16.mxu0 %vm425_vm3, %v2709_v34  ;;  %v2732_v34 = vrot.slane %v4597_v12, 3 }
 0x128   : > { %v1525_v13 = vsel %vm1440_vm2, %v1515_v11, %v1524_v31 }
 0x129   : > { %v2733_v41 = vsel %vm2698_vm7, %v2730_v47, %v2732_v34 }
 0x12c   : > { %3695 = vmatmul.mubr.msk.bf16.gmra.mrb[28].mxu1 %vm425_vm3, %v4977_v58  ;;  %v1488_v58 = vrot.slane %v5373_v14, 1  ;;  %v2718_v14 = vrot.slane %v4482_v25, 3 }
 0x12d   : > { %3698 = vmatprep.mubr.msk.bf16.mxu1 %vm425_vm3, %v1213_v46  ;;  %v2735_v46 = vsel %vm2698_vm7, %v2732_v34, %v2734_v50 }
 0x12e   : > { %3865 = vmatmul.mubr.msk.bf16.gmra.mrb[8].mxu0 %vm425_vm3, %v2711_v24  ;;  %v1490_v56 = vor.u32 %v1489_v40, %v1488_v58  ;;  %v2719_v3 = vsel %vm2698_vm7, %v2716_v0, %v2718_v14  ;;  %v2721_v25 = vsel %vm2698_vm7, %v2718_v14, %v2720_v7 }
 0x12f   : > { %3868 = vmatprep.mubr.msk.bf16.mxu0 %vm425_vm3, %v2713_v61 }
 0x130   : > { %v1491_v53 = vsel %vm1440_vm2, %v1486_v37, %v1490_v56  ;;  %v1495_v54 = vsel %vm1440_vm2, %v1490_v56, %v1494_v2  ;;  %v5188_v2 = vld [vmem:[%s5316_s2] ss:$0 sm:$0xff] }
 0x134   : > { %3699 = vmatmul.mubr.msk.bf16.gmra.mrb[32].mxu1 %vm425_vm3, %v1215_v5 }
 0x135   : > { %3724 = vmatprep.mubr.msk.bf16.mxu1 %vm425_vm3, %v1487_v62 }
 0x136   : > { %3869 = vmatmul.mubr.msk.bf16.gmra.mrb[12].mxu0 %vm425_vm3, %v2715_v22 }
 0x137   : > { %3872 = vmatprep.mubr.msk.bf16.mxu0 %vm425_vm3, %v2717_v28 }
 0x13c   : > { %3725 = vmatmul.mubr.msk.bf16.vlgmr.msra.gmra.mrb[20].mxu1 %vm425_vm3, %v1491_v53 }
 0x13d   : > { %3728 = vmatprep.mubr.msk.bf16.mxu1 %vm425_vm3, %v1495_v54 }
 0x13e   : > { %3873 = vmatmul.mubr.msk.bf16.gmra.mrb[16].mxu0 %vm425_vm3, %v2719_v3 }
 0x13f   : > { %3876 = vmatprep.mubr.msk.bf16.mxu0 %vm425_vm3, %v2721_v25 }
 0x144   : > { %3729 = vmatmul.mubr.msk.bf16.gmra.mrb[24].mxu1 %vm425_vm3, %v1499_v20 }
 0x145   : > { %3732 = vmatprep.mubr.msk.bf16.mxu1 %vm425_vm3, %v1503_v19 }
 0x146   : > { %3877 = vmatmul.mubr.msk.bf16.gmra.mrb[20].mxu0 %vm425_vm3, %v2723_v21 }
 0x147   : > { %3880 = vmatprep.mubr.msk.bf16.mxu0 %vm425_vm3, %v2725_v8 }
 0x14c   : > { %3733 = vmatmul.mubr.msk.bf16.gmra.mrb[28].mxu1 %vm425_vm3, %v1507_v32 }
 0x14d   : > { %3736 = vmatprep.mubr.msk.bf16.mxu1 %vm425_vm3, %v1516_v33 }
 0x14e   : > { %3881 = vmatmul.mubr.msk.bf16.gmra.mrb[24].mxu0 %vm425_vm3, %v2727_v18 }
 0x14f   : > { %3884 = vmatprep.mubr.msk.bf16.mxu0 %vm425_vm3, %v2729_v57 }
 0x154   : > { %3737 = vmatmul.mubr.msk.bf16.gmra.mrb[32].mxu1 %vm425_vm3, %v1525_v13 }
 0x156   : > { %3885 = vmatmul.mubr.msk.bf16.gmra.mrb[28].mxu0 %vm425_vm3, %v2731_v26 }
 0x157   : > { %3888 = vmatprep.mubr.msk.bf16.mxu0 %vm425_vm3, %v2733_v41 }
 0x15e   : > { %3889 = vmatmul.mubr.msk.bf16.gmra.mrb[32].mxu0 %vm425_vm3, %v2735_v46 }
 0x1c7   : > { %v3668_v35 = vpop.f32.mrb[0].mxu1 }
 0x1c8   : > { %v1259_v1 = vpop.f32.mrb[1].mxu1 }
 0x1c9   : > { %v3669_v36 = vpop.f32.mrb[2].mxu1 }
 0x1ca   : > { %v1262_v12 = vpop.f32.mrb[3].mxu1 }
 0x1cf   : > { %v3672_v24 = vpop.f32.mrb[4].mxu1 }
 0x1d0   : > { %v1275_v61 = vpop.f32.mrb[5].mxu1 }
 0x1d1   : > { %v3673_v63 = vpop.f32.mrb[6].mxu1 }
 0x1d2   : > { %v1278_v37 = vpop.f32.mrb[7].mxu1 }
 0x1d7   : > { %v3676_v23 = vpop.f32.mrb[8].mxu1 }
 0x1d8   : > { %v1291_v5 = vpop.f32.mrb[9].mxu1 }
 0x1d9   : > { %v3677_v0 = vpop.f32.mrb[10].mxu1 }
 0x1da   : > { %v1294_v58 = vpop.f32.mrb[11].mxu1 }
 0x1df   : > { %v5168_v40 = vpop.f32.mrb[12].mxu1 }
 0x1e0   : > { %v5170_v52 = vpop.f32.mrb[13].mxu1 }
 0x1e1   : > { %v5172_v51 = vpop.f32.mrb[14].mxu1 }
 0x1e2   : > { %v5174_v62 = vpop.f32.mrb[15].mxu1 }
 0x1e7   : > { %v5176_v48 = vpop.f32.mrb[16].mxu1 }
 0x1e8   : > { %v5178_v59 = vpop.f32.mrb[17].mxu1 }
 0x1e9   : > { %v5180_v22 = vpop.f32.mrb[18].mxu1 }
 0x1ea   : > { %v5182_v28 = vpop.f32.mrb[19].mxu1 }
 0x1f1   : > { %v3858_v56 = vpop.f32.mrb[0].mxu0 }
 0x1f2   : > { %v3894_v14 = vadd.f32 %v3858_v56, %v3668_v35  ;;  %v2827_v53 = vpop.f32.mrb[1].mxu0 }
 0x1f3   : > { %v3895_v7 = vadd.f32 %v2827_v53, %v1259_v1  ;;  %v3859_v16 = vpop.f32.mrb[2].mxu0 }
 0x1f4   : > { %v3015_v6 = vadd.f32 %v3894_v14, %v5188_v2  ;;  %v3896_v54 = vadd.f32 %v3859_v16, %v3669_v36  ;;  %v2830_v30 = vpop.f32.mrb[3].mxu0 }
 0x1f5   : > { %v3013_v10 = vadd.f32 %v3895_v7, %v5188_v2  ;;  %v3897_v3 = vadd.f32 %v2830_v30, %v1262_v12 }
 0x1f6   : > { %v3051_v25 = vmax.f32 %v3015_v6, 0.0  ;;  %v3016_v29 = vadd.f32 %v3896_v54, %v5188_v2 }
 0x1f7   : > { %v3049_v38 = vmax.f32 %v3013_v10, 0.0  ;;  %v3014_v42 = vadd.f32 %v3897_v3, %v5188_v2 }
 0x1f8   : > { %3087 = vst.msk [vmem:[%s5194_s16 + $0x10] sm:$0xff] %vm425_vm3, %v3051_v25  ;;  %v3052_v20 = vmax.f32 %v3016_v29, 0.0 }
 0x1f9   : > { %3085 = vst.msk [vmem:[%s5194_s16] sm:$0xff] %vm425_vm3, %v3049_v38  ;;  %v3050_v49 = vmax.f32 %v3014_v42, 0.0  ;;  %v3862_v27 = vpop.f32.mrb[4].mxu0 }
 0x1fa   : > { %3088 = vst.msk [vmem:[%s5194_s16 + $0x18] sm:$0xff] %vm425_vm3, %v3052_v20  ;;  %v3898_v44 = vadd.f32 %v3862_v27, %v3672_v24  ;;  %v2843_v19 = vpop.f32.mrb[5].mxu0 }
 0x1fb   : > { %3086 = vst.msk [vmem:[%s5194_s16 + $0x8] sm:$0xff] %vm425_vm3, %v3050_v49  ;;  %v3899_v4 = vadd.f32 %v2843_v19, %v1275_v61  ;;  %v3863_v45 = vpop.f32.mrb[6].mxu0 }
 0x1fc   : > { %v3019_v21 = vadd.f32 %v3898_v44, %v5188_v2  ;;  %v3900_v8 = vadd.f32 %v3863_v45, %v3673_v63  ;;  %v2846_v43 = vpop.f32.mrb[7].mxu0 }
 0x1fd   : > { %v3017_v15 = vadd.f32 %v3899_v4, %v5188_v2  ;;  %v3901_v39 = vadd.f32 %v2846_v43, %v1278_v37 }
 0x1fe   : > { %v3055_v11 = vmax.f32 %v3019_v21, 0.0  ;;  %v3020_v60 = vadd.f32 %v3900_v8, %v5188_v2 }
 0x1ff   : > { %v3053_v32 = vmax.f32 %v3017_v15, 0.0  ;;  %v3018_v9 = vadd.f32 %v3901_v39, %v5188_v2 }
 0x200   : > { %3091 = vst.msk [vmem:[%s5194_s16 + $0x30] sm:$0xff] %vm425_vm3, %v3055_v11  ;;  %v3056_v17 = vmax.f32 %v3020_v60, 0.0 }
 0x201   : > { %3089 = vst.msk [vmem:[%s5194_s16 + $0x20] sm:$0xff] %vm425_vm3, %v3053_v32  ;;  %v3054_v55 = vmax.f32 %v3018_v9, 0.0  ;;  %v3866_v33 = vpop.f32.mrb[8].mxu0 }
 0x202   : > { %3092 = vst.msk [vmem:[%s5194_s16 + $0x38] sm:$0xff] %vm425_vm3, %v3056_v17  ;;  %v3902_v18 = vadd.f32 %v3866_v33, %v3676_v23  ;;  %v2859_v57 = vpop.f32.mrb[9].mxu0 }
 0x203   : > { %3090 = vst.msk [vmem:[%s5194_s16 + $0x28] sm:$0xff] %vm425_vm3, %v3054_v55  ;;  %v3903_v31 = vadd.f32 %v2859_v57, %v1291_v5  ;;  %v3867_v47 = vpop.f32.mrb[10].mxu0 }
 0x204   : > { %v3023_v13 = vadd.f32 %v3902_v18, %v5188_v2  ;;  %v3904_v34 = vadd.f32 %v3867_v47, %v3677_v0  ;;  %v2862_v26 = vpop.f32.mrb[11].mxu0 }
 0x205   : > { %v3021_v41 = vadd.f32 %v3903_v31, %v5188_v2  ;;  %v3905_v50 = vadd.f32 %v2862_v26, %v1294_v58 }
 0x206   : > { %v3059_v46 = vmax.f32 %v3023_v13, 0.0  ;;  %v3024_v35 = vadd.f32 %v3904_v34, %v5188_v2 }
 0x207   : > { %v3057_v1 = vmax.f32 %v3021_v41, 0.0  ;;  %v3022_v36 = vadd.f32 %v3905_v50, %v5188_v2 }
 0x208   : > { %3095 = vst.msk [vmem:[%s5194_s16 + $0x50] sm:$0xff] %vm425_vm3, %v3059_v46  ;;  %v3060_v12 = vmax.f32 %v3024_v35, 0.0 }
 0x209   : > { %3093 = vst.msk [vmem:[%s5194_s16 + $0x40] sm:$0xff] %vm425_vm3, %v3057_v1  ;;  %v3058_v24 = vmax.f32 %v3022_v36, 0.0  ;;  %v3870_v61 = vpop.f32.mrb[12].mxu0 }
 0x20a   : > { %3096 = vst.msk [vmem:[%s5194_s16 + $0x58] sm:$0xff] %vm425_vm3, %v3060_v12  ;;  %v3906_v63 = vadd.f32 %v3870_v61, %v5168_v40  ;;  %v2875_v37 = vpop.f32.mrb[13].mxu0 }
 0x20b   : > { %3094 = vst.msk [vmem:[%s5194_s16 + $0x48] sm:$0xff] %vm425_vm3, %v3058_v24  ;;  %v3907_v23 = vadd.f32 %v2875_v37, %v5170_v52  ;;  %v3871_v5 = vpop.f32.mrb[14].mxu0 }
 0x20c   : > { %v3027_v0 = vadd.f32 %v3906_v63, %v5188_v2  ;;  %v3908_v58 = vadd.f32 %v3871_v5, %v5172_v51  ;;  %v2878_v56 = vpop.f32.mrb[15].mxu0 }
 0x20d   : > { %v3025_v14 = vadd.f32 %v3907_v23, %v5188_v2  ;;  %v3909_v53 = vadd.f32 %v2878_v56, %v5174_v62 }
 0x20e   : > { %v3063_v7 = vmax.f32 %v3027_v0, 0.0  ;;  %v3028_v40 = vadd.f32 %v3908_v58, %v5188_v2 }
 0x20f   : > { %v3726_v16 = vpop.f32.mrb[20].mxu1  ;;  %v3061_v6 = vmax.f32 %v3025_v14, 0.0  ;;  %v3026_v52 = vadd.f32 %v3909_v53, %v5188_v2 }
 0x210   : > { %v1697_v54 = vpop.f32.mrb[21].mxu1  ;;  %3099 = vst.msk [vmem:[%s5194_s16 + $0x70] sm:$0xff] %vm425_vm3, %v3063_v7  ;;  %v3064_v30 = vmax.f32 %v3028_v40, 0.0 }
 0x211   : > { %v3727_v10 = vpop.f32.mrb[22].mxu1  ;;  %3097 = vst.msk [vmem:[%s5194_s16 + $0x60] sm:$0xff] %vm425_vm3, %v3061_v6  ;;  %v3062_v51 = vmax.f32 %v3026_v52, 0.0  ;;  %v3874_v3 = vpop.f32.mrb[16].mxu0 }
 0x212   : > { %v1700_v25 = vpop.f32.mrb[23].mxu1  ;;  %3100 = vst.msk [vmem:[%s5194_s16 + $0x78] sm:$0xff] %vm425_vm3, %v3064_v30  ;;  %v3910_v62 = vadd.f32 %v3874_v3, %v5176_v48  ;;  %v2891_v29 = vpop.f32.mrb[17].mxu0 }
 0x213   : > { %3098 = vst.msk [vmem:[%s5194_s16 + $0x68] sm:$0xff] %vm425_vm3, %v3062_v51  ;;  %v3911_v38 = vadd.f32 %v2891_v29, %v5178_v59  ;;  %v3875_v42 = vpop.f32.mrb[18].mxu0 }
 0x214   : > { %v3031_v20 = vadd.f32 %v3910_v62, %v5188_v2  ;;  %v3912_v49 = vadd.f32 %v3875_v42, %v5180_v22  ;;  %v2894_v27 = vpop.f32.mrb[19].mxu0 }
 0x215   : > { %v3029_v44 = vadd.f32 %v3911_v38, %v5188_v2  ;;  %v3913_v19 = vadd.f32 %v2894_v27, %v5182_v28 }
 0x216   : > { %v3067_v4 = vmax.f32 %v3031_v20, 0.0  ;;  %v3032_v48 = vadd.f32 %v3912_v49, %v5188_v2 }
 0x217   : > { %v3730_v45 = vpop.f32.mrb[24].mxu1  ;;  %v3065_v21 = vmax.f32 %v3029_v44, 0.0  ;;  %v3030_v59 = vadd.f32 %v3913_v19, %v5188_v2 }
 0x218   : > { %v1713_v8 = vpop.f32.mrb[25].mxu1  ;;  %3103 = vst.msk [vmem:[%s5194_s16 + $0x90] sm:$0xff] %vm425_vm3, %v3067_v4  ;;  %v3068_v43 = vmax.f32 %v3032_v48, 0.0 }
 0x219   : > { %v3731_v15 = vpop.f32.mrb[26].mxu1  ;;  %3101 = vst.msk [vmem:[%s5194_s16 + $0x80] sm:$0xff] %vm425_vm3, %v3065_v21  ;;  %v3066_v22 = vmax.f32 %v3030_v59, 0.0  ;;  %v3878_v39 = vpop.f32.mrb[20].mxu0 }
 0x21a   : > { %v1716_v11 = vpop.f32.mrb[27].mxu1  ;;  %3104 = vst.msk [vmem:[%s5194_s16 + $0x98] sm:$0xff] %vm425_vm3, %v3068_v43  ;;  %v3914_v28 = vadd.f32 %v3878_v39, %v3726_v16  ;;  %v2907_v60 = vpop.f32.mrb[21].mxu0 }
 0x21b   : > { %3102 = vst.msk [vmem:[%s5194_s16 + $0x88] sm:$0xff] %vm425_vm3, %v3066_v22  ;;  %v3915_v32 = vadd.f32 %v2907_v60, %v1697_v54  ;;  %v3879_v9 = vpop.f32.mrb[22].mxu0 }
 0x21c   : > { %v3035_v17 = vadd.f32 %v3914_v28, %v5188_v2  ;;  %v3916_v55 = vadd.f32 %v3879_v9, %v3727_v10  ;;  %v2910_v33 = vpop.f32.mrb[23].mxu0 }
 0x21d   : > { %v3033_v18 = vadd.f32 %v3915_v32, %v5188_v2  ;;  %v3917_v57 = vadd.f32 %v2910_v33, %v1700_v25 }
 0x21e   : > { %v3071_v31 = vmax.f32 %v3035_v17, 0.0  ;;  %v3036_v47 = vadd.f32 %v3916_v55, %v5188_v2 }
 0x21f   : > { %v3734_v13 = vpop.f32.mrb[28].mxu1  ;;  %v3069_v34 = vmax.f32 %v3033_v18, 0.0  ;;  %v3034_v26 = vadd.f32 %v3917_v57, %v5188_v2 }
 0x220   : > { %v1729_v41 = vpop.f32.mrb[29].mxu1  ;;  %3107 = vst.msk [vmem:[%s5194_s16 + $0xb0] sm:$0xff] %vm425_vm3, %v3071_v31  ;;  %v3072_v50 = vmax.f32 %v3036_v47, 0.0 }
 0x221   : > { %v3735_v46 = vpop.f32.mrb[30].mxu1  ;;  %3105 = vst.msk [vmem:[%s5194_s16 + $0xa0] sm:$0xff] %vm425_vm3, %v3069_v34  ;;  %v3070_v35 = vmax.f32 %v3034_v26, 0.0  ;;  %v3882_v1 = vpop.f32.mrb[24].mxu0 }
 0x222   : > { %v1732_v36 = vpop.f32.mrb[31].mxu1  ;;  %3108 = vst.msk [vmem:[%s5194_s16 + $0xb8] sm:$0xff] %vm425_vm3, %v3072_v50  ;;  %v3918_v12 = vadd.f32 %v3882_v1, %v3730_v45  ;;  %v2923_v24 = vpop.f32.mrb[25].mxu0 }
 0x223   : > { %3106 = vst.msk [vmem:[%s5194_s16 + $0xa8] sm:$0xff] %vm425_vm3, %v3070_v35  ;;  %v3919_v61 = vadd.f32 %v2923_v24, %v1713_v8  ;;  %v3883_v63 = vpop.f32.mrb[26].mxu0 }
 0x224   : > { %v3039_v37 = vadd.f32 %v3918_v12, %v5188_v2  ;;  %v3920_v23 = vadd.f32 %v3883_v63, %v3731_v15  ;;  %v2926_v5 = vpop.f32.mrb[27].mxu0 }
 0x225   : > { %v3037_v0 = vadd.f32 %v3919_v61, %v5188_v2  ;;  %v3921_v58 = vadd.f32 %v2926_v5, %v1716_v11 }
 0x226   : > { %v3075_v56 = vmax.f32 %v3039_v37, 0.0  ;;  %v3040_v14 = vadd.f32 %v3920_v23, %v5188_v2 }
 0x227   : > { %v3738_v53 = vpop.f32.mrb[32].mxu1  ;;  %v3073_v7 = vmax.f32 %v3037_v0, 0.0  ;;  %v3038_v40 = vadd.f32 %v3921_v58, %v5188_v2 }
 0x228   : > { %v1745_v16 = vpop.f32.mrb[33].mxu1  ;;  %3111 = vst.msk [vmem:[%s5194_s16 + $0xd0] sm:$0xff] %vm425_vm3, %v3075_v56  ;;  %v3076_v6 = vmax.f32 %v3040_v14, 0.0 }
 0x229   : > { %v3739_v52 = vpop.f32.mrb[34].mxu1  ;;  %3109 = vst.msk [vmem:[%s5194_s16 + $0xc0] sm:$0xff] %vm425_vm3, %v3073_v7  ;;  %v3074_v54 = vmax.f32 %v3038_v40, 0.0  ;;  %v3886_v30 = vpop.f32.mrb[28].mxu0 }
 0x22a   : > { %v1748_v10 = vpop.f32.mrb[35].mxu1  ;;  %3112 = vst.msk [vmem:[%s5194_s16 + $0xd8] sm:$0xff] %vm425_vm3, %v3076_v6  ;;  %v3922_v51 = vadd.f32 %v3886_v30, %v3734_v13  ;;  %v2939_v3 = vpop.f32.mrb[29].mxu0 }
 0x22b   : > { %3110 = vst.msk [vmem:[%s5194_s16 + $0xc8] sm:$0xff] %vm425_vm3, %v3074_v54  ;;  %v3923_v25 = vadd.f32 %v2939_v3, %v1729_v41  ;;  %v3887_v62 = vpop.f32.mrb[30].mxu0 }
 0x22c   : > { %v3043_v29 = vadd.f32 %v3922_v51, %v5188_v2  ;;  %v3924_v38 = vadd.f32 %v3887_v62, %v3735_v46  ;;  %v2942_v42 = vpop.f32.mrb[31].mxu0 }
 0x22d   : > { %v3041_v20 = vadd.f32 %v3923_v25, %v5188_v2  ;;  %v3925_v49 = vadd.f32 %v2942_v42, %v1732_v36 }
 0x22e   : > { %v3079_v27 = vmax.f32 %v3043_v29, 0.0  ;;  %v3044_v44 = vadd.f32 %v3924_v38, %v5188_v2 }
 0x22f   : > { %v3077_v19 = vmax.f32 %v3041_v20, 0.0  ;;  %v3042_v4 = vadd.f32 %v3925_v49, %v5188_v2 }
 0x230   : > { %3115 = vst.msk [vmem:[%s5194_s16 + $0xf0] sm:$0xff] %vm425_vm3, %v3079_v27  ;;  %v3080_v48 = vmax.f32 %v3044_v44, 0.0 }
 0x231   : > { %3113 = vst.msk [vmem:[%s5194_s16 + $0xe0] sm:$0xff] %vm425_vm3, %v3077_v19  ;;  %v3078_v45 = vmax.f32 %v3042_v4, 0.0  ;;  %v3890_v21 = vpop.f32.mrb[32].mxu0 }
 0x232   : > { %3116 = vst.msk [vmem:[%s5194_s16 + $0xf8] sm:$0xff] %vm425_vm3, %v3080_v48  ;;  %v3926_v59 = vadd.f32 %v3890_v21, %v3738_v53  ;;  %v2955_v8 = vpop.f32.mrb[33].mxu0 }
 0x233   : > { %3114 = vst.msk [vmem:[%s5194_s16 + $0xe8] sm:$0xff] %vm425_vm3, %v3078_v45  ;;  %v3927_v43 = vadd.f32 %v2955_v8, %v1745_v16  ;;  %v3891_v15 = vpop.f32.mrb[34].mxu0 }
 0x234   : > { %v3047_v22 = vadd.f32 %v3926_v59, %v5188_v2  ;;  %v3928_v39 = vadd.f32 %v3891_v15, %v3739_v52  ;;  %v2958_v11 = vpop.f32.mrb[35].mxu0 }
 0x235   : > { %v3045_v28 = vadd.f32 %v3927_v43, %v5188_v2  ;;  %v3929_v60 = vadd.f32 %v2958_v11, %v1748_v10 }
 0x236   : > { %v3083_v32 = vmax.f32 %v3047_v22, 0.0  ;;  %v3048_v9 = vadd.f32 %v3928_v39, %v5188_v2 }
 0x237   : > { %v3081_v17 = vmax.f32 %v3045_v28, 0.0  ;;  %v3046_v55 = vadd.f32 %v3929_v60, %v5188_v2 }
 0x238   : > { %3119 = vst.msk [vmem:[%s5194_s16 + $0x110] sm:$0xff] %vm425_vm3, %v3083_v32  ;;  %v3084_v33 = vmax.f32 %v3048_v9, 0.0 }
 0x239   : > { %3117 = vst.msk [vmem:[%s5194_s16 + $0x100] sm:$0xff] %vm425_vm3, %v3081_v17  ;;  %v3082_v18 = vmax.f32 %v3046_v55, 0.0 }
 0x23a   : > { %3120 = vst.msk [vmem:[%s5194_s16 + $0x118] sm:$0xff] %vm425_vm3, %v3084_v33 }
 0x23b   : > { %3118 = vst.msk [vmem:[%s5194_s16 + $0x108] sm:$0xff] %vm425_vm3, %v3082_v18 }
 0x23c PF: > { %s13_s12 = sadd.s32 1, %s4231_s12  }
 0x23d   : > { %p10_p4 = scmp.ge.s32.totalorder %s13_s12, 4  }
 0x23f   :  { %12 = sbr.rel (!%p10_p4) target bundleno = 1 (0x1), region = 70 }

</bundles_post_ra>
